<compile_context>
chip_gen: v5e
topology: v5e:2x2
jax: 0.10.0
libtpu: 0.0.40
codegen_flags: <defaults>
</compile_context>

<pallas_src>
import math

import jax
import jax.numpy as jnp
from jax import lax
from jax.experimental import pallas as pl
from jax.experimental.pallas import tpu as pltpu

LANE = 128  # TPU lane width; each GRU gate gets its own LANE-wide block.


def _gru_encoder_kernel(tok_ref, gate_tab_ref, whh_ref, bhh_ref, out_ref, hid_ref):
    """One batch-block of the fused embedding + GRU encoder.

    tok_ref      : (B_blk, 1, T)   int32  token ids
    gate_tab_ref : (V, 3*HP)       f32    fused  emb @ W_ih^T + b_ih  (per-gate lane padded)
    whh_ref      : (HP, 3*HP)      f32    hidden weights (per-gate lane padded)
    bhh_ref      : (1, 3*HP)       f32    hidden bias   (per-gate lane padded)
    out_ref      : (B_blk, T, HP)  f32    batch-major outputs (lane dense)
    hid_ref      : (B_blk, 1, HP)  f32    final hidden state
    """
    B_blk = tok_ref.shape[0]
    T = tok_ref.shape[2]
    V = gate_tab_ref.shape[0]
    HP = whh_ref.shape[0]

    tokens = tok_ref[...]          # (B_blk, 1, T)
    gate_tab = gate_tab_ref[...]   # (V, 3*HP)
    whh = whh_ref[...]             # (HP, 3*HP)
    bhh = bhh_ref[...]             # (1, 3*HP)

    iota_v = lax.broadcasted_iota(jnp.int32, (B_blk, V), 1)

    h = jnp.zeros((B_blk, HP), jnp.float32)

    # Fully unrolled recurrence (T static & small).  All indices below are
    # static, so every load/store is a static, lane-aligned slice.
    for t in range(T):
        tok_t = tokens[:, :, t]                                   # (B_blk, 1)
        onehot = (tok_t == iota_v).astype(jnp.float32)            # (B_blk, V)
        # Fused embedding lookup + input projection (+ b_ih): one tiny matmul.
        # Out-of-range ids yield an all-zero row (== zero embedding), like the
        # previous version; PyTorch would raise instead.
        xg = jnp.dot(onehot, gate_tab, preferred_element_type=jnp.float32)   # (B_blk, 3HP)
        hg = jnp.dot(h, whh, preferred_element_type=jnp.float32) + bhh       # (B_blk, 3HP)

        # Gate slices sit exactly on 128-lane block boundaries.
        x_r, x_z, x_n = xg[:, :HP], xg[:, HP:2 * HP], xg[:, 2 * HP:]
        h_r, h_z, h_n = hg[:, :HP], hg[:, HP:2 * HP], hg[:, 2 * HP:]

        r = jax.nn.sigmoid(x_r + h_r)
        z = jax.nn.sigmoid(x_z + h_z)
        n = jnp.tanh(x_n + r * h_n)
        h = (1.0 - z) * n + z * h

        out_ref[:, t, :] = h           # lane-dense (HP=128) batch-major store

    hid_ref[:, 0, :] = h


def _pad_gate_blocks(m, H, HP):
    """(rows, 3H) -> (rows, 3*HP): each gate padded to its own LANE-wide block."""
    rows = m.shape[0]
    out = jnp.zeros((rows, 3 * HP), m.dtype)
    for g in range(3):
        out = out.at[:, g * HP:g * HP + H].set(m[:, g * H:(g + 1) * H])
    return out


def encoder_forward(tokens, emb, wih_t, whh_t, bih, bhh, *, batch_block=None):
    """tokens: (B, T) int.  Weights in pre-transposed PyTorch layout:
       emb (V,E), wih_t (E,3H), whh_t (H,3H), bih (1,3H), bhh (1,3H),
       gate order (r, z, n).  Returns (outputs (B,T,H), hidden (1,B,H))."""
    B, T = tokens.shape
    V, _ = emb.shape
    H = whh_t.shape[0]
    HP = max(LANE, ((H + LANE - 1) // LANE) * LANE)

    if batch_block is None:
        # One block by default (no grid overhead at tiny B).  For large B, set
        # batch_block = B // 2 (v7x dual-TC) or >=128-row chunks (MXU occupancy).
        batch_block = B
    assert B % batch_block == 0
    grid = (B // batch_block,)

    # ---- token-independent parameter prep (done once, outside the kernel) ----
    # Fused gate table: G[v] = emb[v] @ W_ih^T + b_ih  (row 0 = b_ih since the
    # padding_idx=0 embedding row is zero — exactly PyTorch's semantics).
    gate_tab = _pad_gate_blocks(jnp.dot(emb, wih_t) + bih, H, HP)        # (V, 3HP)
    whh_pad = jnp.zeros((HP, 3 * HP), jnp.float32)
    whh_pad = whh_pad.at[:H].set(_pad_gate_blocks(whh_t, H, HP))         # (HP, 3HP)
    bhh_pad = _pad_gate_blocks(bhh, H, HP)                               # (1, 3HP)

    tokens_3d = tokens.astype(jnp.int32)[:, None, :]                     # (B, 1, T)

    out_pad, hid_pad = pl.pallas_call(
        _gru_encoder_kernel,
        out_shape=(
            jax.ShapeDtypeStruct((B, T, HP), jnp.float32),
            jax.ShapeDtypeStruct((B, 1, HP), jnp.float32),
        ),
        grid=grid,
        in_specs=[
            pl.BlockSpec((batch_block, 1, T), lambda i: (i, 0, 0)),
            pl.BlockSpec((V, 3 * HP), lambda i: (0, 0)),
            pl.BlockSpec((HP, 3 * HP), lambda i: (0, 0)),
            pl.BlockSpec((1, 3 * HP), lambda i: (0, 0)),
        ],
        out_specs=(
            pl.BlockSpec((batch_block, T, HP), lambda i: (i, 0, 0)),
            pl.BlockSpec((batch_block, 1, HP), lambda i: (i, 0, 0)),
        ),
        compiler_params=pltpu.CompilerParams(
            dimension_semantics=("parallel",),
        ),
    )(tokens_3d, gate_tab, whh_pad, bhh_pad)

    outputs = out_pad[:, :, :H]            # (B, T, H) — already batch-major
    hidden = hid_pad[:, 0, :H][None]       # (1, B, H)
    return outputs, hidden


def encoder_reference(tokens, emb, wih_t, whh_t, bih, bhh):
    """Pure-JAX reference matching torch semantics (for verification)."""
    embedded = emb[tokens]                                         # (B, T, E)
    B, T, _ = embedded.shape
    H = whh_t.shape[0]
    xg = jnp.einsum('bte,eg->btg', embedded, wih_t) + bih[0]

    def step(h, xg_t):
        hg = h @ whh_t + bhh[0]
        x_r, x_z, x_n = jnp.split(xg_t, 3, axis=-1)
        h_r, h_z, h_n = jnp.split(hg, 3, axis=-1)
        r = jax.nn.sigmoid(x_r + h_r)
        z = jax.nn.sigmoid(x_z + h_z)
        n = jnp.tanh(x_n + r * h_n)
        h_new = (1.0 - z) * n + z * h
        return h_new, h_new

    h0 = jnp.zeros((B, H), jnp.float32)
    hT, outs = jax.lax.scan(step, h0, jnp.transpose(xg, (1, 0, 2)))
    return jnp.transpose(outs, (1, 0, 2)), hT[None]


if __name__ == "__main__":
    # Small shapes implied by the module: vocab=16, emb=16, hidden=32, batch=2, seq=8
    V, E, H = 16, 16, 32
    B, T = 2, 8

    key = jax.random.PRNGKey(0)
    k_emb, k_wih, k_whh, k_bih, k_bhh, k_tok = jax.random.split(key, 6)

    # nn.Embedding(vocab, emb, padding_idx=0): N(0,1) init, row 0 zeroed.
    emb = jax.random.normal(k_emb, (V, E), jnp.float32)
    emb = emb.at[0].set(0.0)

    # nn.GRU(E, H): U(-1/sqrt(H), 1/sqrt(H)) init; gate order (r, z, n).
    bound = 1.0 / math.sqrt(H)
    w_ih = jax.random.uniform(k_wih, (3 * H, E), jnp.float32, -bound, bound)
    w_hh = jax.random.uniform(k_whh, (3 * H, H), jnp.float32, -bound, bound)
    b_ih = jax.random.uniform(k_bih, (1, 3 * H), jnp.float32, -bound, bound)
    b_hh = jax.random.uniform(k_bhh, (1, 3 * H), jnp.float32, -bound, bound)
    wih_t = w_ih.T    # (E, 3H)
    whh_t = w_hh.T    # (H, 3H)

    # Token ids, with a few 0s acting as padding.
    tokens = jax.random.randint(k_tok, (B, T), 0, V, dtype=jnp.int32)
    tokens = tokens.at[:, -1].set(0)

    outputs, hidden = jax.block_until_ready(
        encoder_forward(tokens, emb, wih_t, whh_t, b_ih, b_hh))

    ref_out, ref_hid = encoder_reference(tokens, emb, wih_t, whh_t, b_ih, b_hh)

    assert outputs.shape == (B, T, H) and hidden.shape == (1, B, H)
    assert jnp.allclose(outputs, ref_out, atol=1e-4, rtol=1e-4)
    assert jnp.allclose(hidden, ref_hid, atol=1e-4, rtol=1e-4)

    print("KERNEL_OK")
</pallas_src>

<mosaic_0001>
module attributes {stable_mosaic.version = 11 : i64} {
  func.func @_gru_encoder_kernel(%arg0: i32, %arg1: memref<2x1x8xi32, #tpu.memory_space<vmem>>, %arg2: memref<16x384xf32, #tpu.memory_space<vmem>>, %arg3: memref<128x384xf32, #tpu.memory_space<vmem>>, %arg4: memref<1x384xf32, #tpu.memory_space<vmem>>, %arg5: memref<2x8x128xf32, #tpu.memory_space<vmem>>, %arg6: memref<2x1x128xf32, #tpu.memory_space<vmem>>) attributes {dimension_semantics = [#tpu.dimension_semantics<parallel>], iteration_bounds = array<i64: 1>, scalar_prefetch = 0 : i64, scratch_operands = 0 : i64, tpu.core_type = #tpu.core_type<tc>, window_params = [{transform_indices = @transform_0, window_bounds = array<i64: 2, 1, 8>}, {pipeline_mode = #tpu.pipeline_mode<synchronous>, transform_indices = @transform_1, window_bounds = array<i64: 16, 384>}, {pipeline_mode = #tpu.pipeline_mode<synchronous>, transform_indices = @transform_2, window_bounds = array<i64: 128, 384>}, {pipeline_mode = #tpu.pipeline_mode<synchronous>, transform_indices = @transform_3, window_bounds = array<i64: 1, 384>}, {transform_indices = @transform_4, window_bounds = array<i64: 2, 8, 128>}, {transform_indices = @transform_5, window_bounds = array<i64: 2, 1, 128>}]} {
    %c0 = arith.constant 0 : index
    %c0_0 = arith.constant 0 : index
    %c0_1 = arith.constant 0 : index
    %0 = vector.load %arg1[%c0, %c0_0, %c0_1] : memref<2x1x8xi32, #tpu.memory_space<vmem>>, vector<2x1x8xi32>
    %c0_2 = arith.constant 0 : index
    %c0_3 = arith.constant 0 : index
    %1 = vector.load %arg2[%c0_2, %c0_3] : memref<16x384xf32, #tpu.memory_space<vmem>>, vector<16x384xf32>
    %c0_4 = arith.constant 0 : index
    %c0_5 = arith.constant 0 : index
    %2 = vector.load %arg3[%c0_4, %c0_5] : memref<128x384xf32, #tpu.memory_space<vmem>>, vector<128x384xf32>
    %c0_6 = arith.constant 0 : index
    %c0_7 = arith.constant 0 : index
    %3 = vector.load %arg4[%c0_6, %c0_7] : memref<1x384xf32, #tpu.memory_space<vmem>>, vector<1x384xf32>
    %4 = tpu.iota {dimensions = array<i32: 1>} : vector<2x16xi32>
    %cst = arith.constant 0.000000e+00 : f32
    %5 = vector.broadcast %cst : f32 to vector<2x128xf32>
    %6 = vector.extract_strided_slice %0 {offsets = [0, 0, 0], sizes = [2, 1, 1], strides = [1, 1, 1]} : vector<2x1x8xi32> to vector<2x1x1xi32>
    %7 = vector.shape_cast %6 : vector<2x1x1xi32> to vector<2x1xi32>
    %8 = vector.broadcast %7 : vector<2x1xi32> to vector<2x16xi32>
    %9 = arith.cmpi eq, %8, %4 : vector<2x16xi32>
    %10 = arith.extui %9 : vector<2x16xi1> to vector<2x16xi32>
    %11 = arith.sitofp %10 : vector<2x16xi32> to vector<2x16xf32>
    %cst_8 = arith.constant dense<0.000000e+00> : vector<2x384xf32>
    %12 = tpu.matmul %11, %1, %cst_8 {dimension_numbers = #tpu.dot_dimension_numbers<[1], [0], [0], [1], [0, 0, 1, 1], [], []>} : vector<2x16xf32>, vector<16x384xf32>, vector<2x384xf32> -> vector<2x384xf32>
    %cst_9 = arith.constant dense<0.000000e+00> : vector<2x384xf32>
    %13 = tpu.matmul %5, %2, %cst_9 {dimension_numbers = #tpu.dot_dimension_numbers<[1], [0], [0], [1], [0, 0, 1, 1], [], []>} : vector<2x128xf32>, vector<128x384xf32>, vector<2x384xf32> -> vector<2x384xf32>
    %14 = vector.broadcast %3 : vector<1x384xf32> to vector<2x384xf32>
    %15 = arith.addf %13, %14 : vector<2x384xf32>
    %16 = vector.extract_strided_slice %12 {offsets = [0, 0], sizes = [2, 128], strides = [1, 1]} : vector<2x384xf32> to vector<2x128xf32>
    %17 = vector.extract_strided_slice %12 {offsets = [0, 128], sizes = [2, 128], strides = [1, 1]} : vector<2x384xf32> to vector<2x128xf32>
    %18 = vector.extract_strided_slice %12 {offsets = [0, 256], sizes = [2, 128], strides = [1, 1]} : vector<2x384xf32> to vector<2x128xf32>
    %19 = vector.extract_strided_slice %15 {offsets = [0, 0], sizes = [2, 128], strides = [1, 1]} : vector<2x384xf32> to vector<2x128xf32>
    %20 = vector.extract_strided_slice %15 {offsets = [0, 128], sizes = [2, 128], strides = [1, 1]} : vector<2x384xf32> to vector<2x128xf32>
    %21 = vector.extract_strided_slice %15 {offsets = [0, 256], sizes = [2, 128], strides = [1, 1]} : vector<2x384xf32> to vector<2x128xf32>
    %22 = arith.addf %16, %19 : vector<2x128xf32>
    %23 = arith.negf %22 : vector<2x128xf32>
    %24 = math.exp %23 : vector<2x128xf32>
    %cst_10 = arith.constant 1.000000e+00 : f32
    %25 = vector.broadcast %cst_10 : f32 to vector<2x128xf32>
    %26 = arith.addf %25, %24 : vector<2x128xf32>
    %27 = arith.divf %25, %26 : vector<2x128xf32>
    %28 = arith.addf %17, %20 : vector<2x128xf32>
    %29 = arith.negf %28 : vector<2x128xf32>
    %30 = math.exp %29 : vector<2x128xf32>
    %cst_11 = arith.constant 1.000000e+00 : f32
    %31 = vector.broadcast %cst_11 : f32 to vector<2x128xf32>
    %32 = arith.addf %31, %30 : vector<2x128xf32>
    %33 = arith.divf %31, %32 : vector<2x128xf32>
    %34 = arith.mulf %27, %21 : vector<2x128xf32>
    %35 = arith.addf %18, %34 : vector<2x128xf32>
    %36 = math.tanh %35 : vector<2x128xf32>
    %cst_12 = arith.constant 1.000000e+00 : f32
    %37 = vector.broadcast %cst_12 : f32 to vector<2x128xf32>
    %38 = arith.subf %37, %33 : vector<2x128xf32>
    %39 = arith.mulf %38, %36 : vector<2x128xf32>
    %40 = arith.mulf %33, %5 : vector<2x128xf32>
    %41 = arith.addf %39, %40 : vector<2x128xf32>
    %c0_13 = arith.constant 0 : index
    %c0_14 = arith.constant 0 : index
    %c0_15 = arith.constant 0 : index
    %42 = vector.load %arg5[%c0_13, %c0_14, %c0_15] : memref<2x8x128xf32, #tpu.memory_space<vmem>>, vector<2x1x128xf32>
    %43 = vector.shape_cast %42 : vector<2x1x128xf32> to vector<2x128xf32>
    %44 = vector.shape_cast %41 : vector<2x128xf32> to vector<2x1x128xf32>
    tpu.vector_store %arg5[%c0_13, %c0_14, %c0_15], %44 {strides = array<i32>} : memref<2x8x128xf32, #tpu.memory_space<vmem>>, vector<2x1x128xf32>,
    %45 = vector.extract_strided_slice %0 {offsets = [0, 0, 1], sizes = [2, 1, 1], strides = [1, 1, 1]} : vector<2x1x8xi32> to vector<2x1x1xi32>
    %46 = vector.shape_cast %45 : vector<2x1x1xi32> to vector<2x1xi32>
    %47 = vector.broadcast %46 : vector<2x1xi32> to vector<2x16xi32>
    %48 = arith.cmpi eq, %47, %4 : vector<2x16xi32>
    %49 = arith.extui %48 : vector<2x16xi1> to vector<2x16xi32>
    %50 = arith.sitofp %49 : vector<2x16xi32> to vector<2x16xf32>
    %cst_16 = arith.constant dense<0.000000e+00> : vector<2x384xf32>
    %51 = tpu.matmul %50, %1, %cst_16 {dimension_numbers = #tpu.dot_dimension_numbers<[1], [0], [0], [1], [0, 0, 1, 1], [], []>} : vector<2x16xf32>, vector<16x384xf32>, vector<2x384xf32> -> vector<2x384xf32>
    %cst_17 = arith.constant dense<0.000000e+00> : vector<2x384xf32>
    %52 = tpu.matmul %41, %2, %cst_17 {dimension_numbers = #tpu.dot_dimension_numbers<[1], [0], [0], [1], [0, 0, 1, 1], [], []>} : vector<2x128xf32>, vector<128x384xf32>, vector<2x384xf32> -> vector<2x384xf32>
    %53 = vector.broadcast %3 : vector<1x384xf32> to vector<2x384xf32>
    %54 = arith.addf %52, %53 : vector<2x384xf32>
    %55 = vector.extract_strided_slice %51 {offsets = [0, 0], sizes = [2, 128], strides = [1, 1]} : vector<2x384xf32> to vector<2x128xf32>
    %56 = vector.extract_strided_slice %51 {offsets = [0, 128], sizes = [2, 128], strides = [1, 1]} : vector<2x384xf32> to vector<2x128xf32>
    %57 = vector.extract_strided_slice %51 {offsets = [0, 256], sizes = [2, 128], strides = [1, 1]} : vector<2x384xf32> to vector<2x128xf32>
    %58 = vector.extract_strided_slice %54 {offsets = [0, 0], sizes = [2, 128], strides = [1, 1]} : vector<2x384xf32> to vector<2x128xf32>
    %59 = vector.extract_strided_slice %54 {offsets = [0, 128], sizes = [2, 128], strides = [1, 1]} : vector<2x384xf32> to vector<2x128xf32>
    %60 = vector.extract_strided_slice %54 {offsets = [0, 256], sizes = [2, 128], strides = [1, 1]} : vector<2x384xf32> to vector<2x128xf32>
    %61 = arith.addf %55, %58 : vector<2x128xf32>
    %62 = arith.negf %61 : vector<2x128xf32>
    %63 = math.exp %62 : vector<2x128xf32>
    %cst_18 = arith.constant 1.000000e+00 : f32
    %64 = vector.broadcast %cst_18 : f32 to vector<2x128xf32>
    %65 = arith.addf %64, %63 : vector<2x128xf32>
    %66 = arith.divf %64, %65 : vector<2x128xf32>
    %67 = arith.addf %56, %59 : vector<2x128xf32>
    %68 = arith.negf %67 : vector<2x128xf32>
    %69 = math.exp %68 : vector<2x128xf32>
    %cst_19 = arith.constant 1.000000e+00 : f32
    %70 = vector.broadcast %cst_19 : f32 to vector<2x128xf32>
    %71 = arith.addf %70, %69 : vector<2x128xf32>
    %72 = arith.divf %70, %71 : vector<2x128xf32>
    %73 = arith.mulf %66, %60 : vector<2x128xf32>
    %74 = arith.addf %57, %73 : vector<2x128xf32>
    %75 = math.tanh %74 : vector<2x128xf32>
    %cst_20 = arith.constant 1.000000e+00 : f32
    %76 = vector.broadcast %cst_20 : f32 to vector<2x128xf32>
    %77 = arith.subf %76, %72 : vector<2x128xf32>
    %78 = arith.mulf %77, %75 : vector<2x128xf32>
    %79 = arith.mulf %72, %41 : vector<2x128xf32>
    %80 = arith.addf %78, %79 : vector<2x128xf32>
    %c0_21 = arith.constant 0 : index
    %c1 = arith.constant 1 : index
    %c0_22 = arith.constant 0 : index
    %81 = vector.load %arg5[%c0_21, %c1, %c0_22] : memref<2x8x128xf32, #tpu.memory_space<vmem>>, vector<2x1x128xf32>
    %82 = vector.shape_cast %81 : vector<2x1x128xf32> to vector<2x128xf32>
    %83 = vector.shape_cast %80 : vector<2x128xf32> to vector<2x1x128xf32>
    tpu.vector_store %arg5[%c0_21, %c1, %c0_22], %83 {strides = array<i32>} : memref<2x8x128xf32, #tpu.memory_space<vmem>>, vector<2x1x128xf32>,
    %84 = vector.extract_strided_slice %0 {offsets = [0, 0, 2], sizes = [2, 1, 1], strides = [1, 1, 1]} : vector<2x1x8xi32> to vector<2x1x1xi32>
    %85 = vector.shape_cast %84 : vector<2x1x1xi32> to vector<2x1xi32>
    %86 = vector.broadcast %85 : vector<2x1xi32> to vector<2x16xi32>
    %87 = arith.cmpi eq, %86, %4 : vector<2x16xi32>
    %88 = arith.extui %87 : vector<2x16xi1> to vector<2x16xi32>
    %89 = arith.sitofp %88 : vector<2x16xi32> to vector<2x16xf32>
    %cst_23 = arith.constant dense<0.000000e+00> : vector<2x384xf32>
    %90 = tpu.matmul %89, %1, %cst_23 {dimension_numbers = #tpu.dot_dimension_numbers<[1], [0], [0], [1], [0, 0, 1, 1], [], []>} : vector<2x16xf32>, vector<16x384xf32>, vector<2x384xf32> -> vector<2x384xf32>
    %cst_24 = arith.constant dense<0.000000e+00> : vector<2x384xf32>
    %91 = tpu.matmul %80, %2, %cst_24 {dimension_numbers = #tpu.dot_dimension_numbers<[1], [0], [0], [1], [0, 0, 1, 1], [], []>} : vector<2x128xf32>, vector<128x384xf32>, vector<2x384xf32> -> vector<2x384xf32>
    %92 = vector.broadcast %3 : vector<1x384xf32> to vector<2x384xf32>
    %93 = arith.addf %91, %92 : vector<2x384xf32>
    %94 = vector.extract_strided_slice %90 {offsets = [0, 0], sizes = [2, 128], strides = [1, 1]} : vector<2x384xf32> to vector<2x128xf32>
    %95 = vector.extract_strided_slice %90 {offsets = [0, 128], sizes = [2, 128], strides = [1, 1]} : vector<2x384xf32> to vector<2x128xf32>
    %96 = vector.extract_strided_slice %90 {offsets = [0, 256], sizes = [2, 128], strides = [1, 1]} : vector<2x384xf32> to vector<2x128xf32>
    %97 = vector.extract_strided_slice %93 {offsets = [0, 0], sizes = [2, 128], strides = [1, 1]} : vector<2x384xf32> to vector<2x128xf32>
    %98 = vector.extract_strided_slice %93 {offsets = [0, 128], sizes = [2, 128], strides = [1, 1]} : vector<2x384xf32> to vector<2x128xf32>
    %99 = vector.extract_strided_slice %93 {offsets = [0, 256], sizes = [2, 128], strides = [1, 1]} : vector<2x384xf32> to vector<2x128xf32>
    %100 = arith.addf %94, %97 : vector<2x128xf32>
    %101 = arith.negf %100 : vector<2x128xf32>
    %102 = math.exp %101 : vector<2x128xf32>
    %cst_25 = arith.constant 1.000000e+00 : f32
    %103 = vector.broadcast %cst_25 : f32 to vector<2x128xf32>
    %104 = arith.addf %103, %102 : vector<2x128xf32>
    %105 = arith.divf %103, %104 : vector<2x128xf32>
    %106 = arith.addf %95, %98 : vector<2x128xf32>
    %107 = arith.negf %106 : vector<2x128xf32>
    %108 = math.exp %107 : vector<2x128xf32>
    %cst_26 = arith.constant 1.000000e+00 : f32
    %109 = vector.broadcast %cst_26 : f32 to vector<2x128xf32>
    %110 = arith.addf %109, %108 : vector<2x128xf32>
    %111 = arith.divf %109, %110 : vector<2x128xf32>
    %112 = arith.mulf %105, %99 : vector<2x128xf32>
    %113 = arith.addf %96, %112 : vector<2x128xf32>
    %114 = math.tanh %113 : vector<2x128xf32>
    %cst_27 = arith.constant 1.000000e+00 : f32
    %115 = vector.broadcast %cst_27 : f32 to vector<2x128xf32>
    %116 = arith.subf %115, %111 : vector<2x128xf32>
    %117 = arith.mulf %116, %114 : vector<2x128xf32>
    %118 = arith.mulf %111, %80 : vector<2x128xf32>
    %119 = arith.addf %117, %118 : vector<2x128xf32>
    %c0_28 = arith.constant 0 : index
    %c2 = arith.constant 2 : index
    %c0_29 = arith.constant 0 : index
    %120 = vector.load %arg5[%c0_28, %c2, %c0_29] : memref<2x8x128xf32, #tpu.memory_space<vmem>>, vector<2x1x128xf32>
    %121 = vector.shape_cast %120 : vector<2x1x128xf32> to vector<2x128xf32>
    %122 = vector.shape_cast %119 : vector<2x128xf32> to vector<2x1x128xf32>
    tpu.vector_store %arg5[%c0_28, %c2, %c0_29], %122 {strides = array<i32>} : memref<2x8x128xf32, #tpu.memory_space<vmem>>, vector<2x1x128xf32>,
    %123 = vector.extract_strided_slice %0 {offsets = [0, 0, 3], sizes = [2, 1, 1], strides = [1, 1, 1]} : vector<2x1x8xi32> to vector<2x1x1xi32>
    %124 = vector.shape_cast %123 : vector<2x1x1xi32> to vector<2x1xi32>
    %125 = vector.broadcast %124 : vector<2x1xi32> to vector<2x16xi32>
    %126 = arith.cmpi eq, %125, %4 : vector<2x16xi32>
    %127 = arith.extui %126 : vector<2x16xi1> to vector<2x16xi32>
    %128 = arith.sitofp %127 : vector<2x16xi32> to vector<2x16xf32>
    %cst_30 = arith.constant dense<0.000000e+00> : vector<2x384xf32>
    %129 = tpu.matmul %128, %1, %cst_30 {dimension_numbers = #tpu.dot_dimension_numbers<[1], [0], [0], [1], [0, 0, 1, 1], [], []>} : vector<2x16xf32>, vector<16x384xf32>, vector<2x384xf32> -> vector<2x384xf32>
    %cst_31 = arith.constant dense<0.000000e+00> : vector<2x384xf32>
    %130 = tpu.matmul %119, %2, %cst_31 {dimension_numbers = #tpu.dot_dimension_numbers<[1], [0], [0], [1], [0, 0, 1, 1], [], []>} : vector<2x128xf32>, vector<128x384xf32>, vector<2x384xf32> -> vector<2x384xf32>
    %131 = vector.broadcast %3 : vector<1x384xf32> to vector<2x384xf32>
    %132 = arith.addf %130, %131 : vector<2x384xf32>
    %133 = vector.extract_strided_slice %129 {offsets = [0, 0], sizes = [2, 128], strides = [1, 1]} : vector<2x384xf32> to vector<2x128xf32>
    %134 = vector.extract_strided_slice %129 {offsets = [0, 128], sizes = [2, 128], strides = [1, 1]} : vector<2x384xf32> to vector<2x128xf32>
    %135 = vector.extract_strided_slice %129 {offsets = [0, 256], sizes = [2, 128], strides = [1, 1]} : vector<2x384xf32> to vector<2x128xf32>
    %136 = vector.extract_strided_slice %132 {offsets = [0, 0], sizes = [2, 128], strides = [1, 1]} : vector<2x384xf32> to vector<2x128xf32>
    %137 = vector.extract_strided_slice %132 {offsets = [0, 128], sizes = [2, 128], strides = [1, 1]} : vector<2x384xf32> to vector<2x128xf32>
    %138 = vector.extract_strided_slice %132 {offsets = [0, 256], sizes = [2, 128], strides = [1, 1]} : vector<2x384xf32> to vector<2x128xf32>
    %139 = arith.addf %133, %136 : vector<2x128xf32>
    %140 = arith.negf %139 : vector<2x128xf32>
    %141 = math.exp %140 : vector<2x128xf32>
    %cst_32 = arith.constant 1.000000e+00 : f32
    %142 = vector.broadcast %cst_32 : f32 to vector<2x128xf32>
    %143 = arith.addf %142, %141 : vector<2x128xf32>
    %144 = arith.divf %142, %143 : vector<2x128xf32>
    %145 = arith.addf %134, %137 : vector<2x128xf32>
    %146 = arith.negf %145 : vector<2x128xf32>
    %147 = math.exp %146 : vector<2x128xf32>
    %cst_33 = arith.constant 1.000000e+00 : f32
    %148 = vector.broadcast %cst_33 : f32 to vector<2x128xf32>
    %149 = arith.addf %148, %147 : vector<2x128xf32>
    %150 = arith.divf %148, %149 : vector<2x128xf32>
    %151 = arith.mulf %144, %138 : vector<2x128xf32>
    %152 = arith.addf %135, %151 : vector<2x128xf32>
    %153 = math.tanh %152 : vector<2x128xf32>
    %cst_34 = arith.constant 1.000000e+00 : f32
    %154 = vector.broadcast %cst_34 : f32 to vector<2x128xf32>
    %155 = arith.subf %154, %150 : vector<2x128xf32>
    %156 = arith.mulf %155, %153 : vector<2x128xf32>
    %157 = arith.mulf %150, %119 : vector<2x128xf32>
    %158 = arith.addf %156, %157 : vector<2x128xf32>
    %c0_35 = arith.constant 0 : index
    %c3 = arith.constant 3 : index
    %c0_36 = arith.constant 0 : index
    %159 = vector.load %arg5[%c0_35, %c3, %c0_36] : memref<2x8x128xf32, #tpu.memory_space<vmem>>, vector<2x1x128xf32>
    %160 = vector.shape_cast %159 : vector<2x1x128xf32> to vector<2x128xf32>
    %161 = vector.shape_cast %158 : vector<2x128xf32> to vector<2x1x128xf32>
    tpu.vector_store %arg5[%c0_35, %c3, %c0_36], %161 {strides = array<i32>} : memref<2x8x128xf32, #tpu.memory_space<vmem>>, vector<2x1x128xf32>,
    %162 = vector.extract_strided_slice %0 {offsets = [0, 0, 4], sizes = [2, 1, 1], strides = [1, 1, 1]} : vector<2x1x8xi32> to vector<2x1x1xi32>
    %163 = vector.shape_cast %162 : vector<2x1x1xi32> to vector<2x1xi32>
    %164 = vector.broadcast %163 : vector<2x1xi32> to vector<2x16xi32>
    %165 = arith.cmpi eq, %164, %4 : vector<2x16xi32>
    %166 = arith.extui %165 : vector<2x16xi1> to vector<2x16xi32>
    %167 = arith.sitofp %166 : vector<2x16xi32> to vector<2x16xf32>
    %cst_37 = arith.constant dense<0.000000e+00> : vector<2x384xf32>
    %168 = tpu.matmul %167, %1, %cst_37 {dimension_numbers = #tpu.dot_dimension_numbers<[1], [0], [0], [1], [0, 0, 1, 1], [], []>} : vector<2x16xf32>, vector<16x384xf32>, vector<2x384xf32> -> vector<2x384xf32>
    %cst_38 = arith.constant dense<0.000000e+00> : vector<2x384xf32>
    %169 = tpu.matmul %158, %2, %cst_38 {dimension_numbers = #tpu.dot_dimension_numbers<[1], [0], [0], [1], [0, 0, 1, 1], [], []>} : vector<2x128xf32>, vector<128x384xf32>, vector<2x384xf32> -> vector<2x384xf32>
    %170 = vector.broadcast %3 : vector<1x384xf32> to vector<2x384xf32>
    %171 = arith.addf %169, %170 : vector<2x384xf32>
    %172 = vector.extract_strided_slice %168 {offsets = [0, 0], sizes = [2, 128], strides = [1, 1]} : vector<2x384xf32> to vector<2x128xf32>
    %173 = vector.extract_strided_slice %168 {offsets = [0, 128], sizes = [2, 128], strides = [1, 1]} : vector<2x384xf32> to vector<2x128xf32>
    %174 = vector.extract_strided_slice %168 {offsets = [0, 256], sizes = [2, 128], strides = [1, 1]} : vector<2x384xf32> to vector<2x128xf32>
    %175 = vector.extract_strided_slice %171 {offsets = [0, 0], sizes = [2, 128], strides = [1, 1]} : vector<2x384xf32> to vector<2x128xf32>
    %176 = vector.extract_strided_slice %171 {offsets = [0, 128], sizes = [2, 128], strides = [1, 1]} : vector<2x384xf32> to vector<2x128xf32>
    %177 = vector.extract_strided_slice %171 {offsets = [0, 256], sizes = [2, 128], strides = [1, 1]} : vector<2x384xf32> to vector<2x128xf32>
    %178 = arith.addf %172, %175 : vector<2x128xf32>
    %179 = arith.negf %178 : vector<2x128xf32>
    %180 = math.exp %179 : vector<2x128xf32>
    %cst_39 = arith.constant 1.000000e+00 : f32
    %181 = vector.broadcast %cst_39 : f32 to vector<2x128xf32>
    %182 = arith.addf %181, %180 : vector<2x128xf32>
    %183 = arith.divf %181, %182 : vector<2x128xf32>
    %184 = arith.addf %173, %176 : vector<2x128xf32>
    %185 = arith.negf %184 : vector<2x128xf32>
    %186 = math.exp %185 : vector<2x128xf32>
    %cst_40 = arith.constant 1.000000e+00 : f32
    %187 = vector.broadcast %cst_40 : f32 to vector<2x128xf32>
    %188 = arith.addf %187, %186 : vector<2x128xf32>
    %189 = arith.divf %187, %188 : vector<2x128xf32>
    %190 = arith.mulf %183, %177 : vector<2x128xf32>
    %191 = arith.addf %174, %190 : vector<2x128xf32>
    %192 = math.tanh %191 : vector<2x128xf32>
    %cst_41 = arith.constant 1.000000e+00 : f32
    %193 = vector.broadcast %cst_41 : f32 to vector<2x128xf32>
    %194 = arith.subf %193, %189 : vector<2x128xf32>
    %195 = arith.mulf %194, %192 : vector<2x128xf32>
    %196 = arith.mulf %189, %158 : vector<2x128xf32>
    %197 = arith.addf %195, %196 : vector<2x128xf32>
    %c0_42 = arith.constant 0 : index
    %c4 = arith.constant 4 : index
    %c0_43 = arith.constant 0 : index
    %198 = vector.load %arg5[%c0_42, %c4, %c0_43] : memref<2x8x128xf32, #tpu.memory_space<vmem>>, vector<2x1x128xf32>
    %199 = vector.shape_cast %198 : vector<2x1x128xf32> to vector<2x128xf32>
    %200 = vector.shape_cast %197 : vector<2x128xf32> to vector<2x1x128xf32>
    tpu.vector_store %arg5[%c0_42, %c4, %c0_43], %200 {strides = array<i32>} : memref<2x8x128xf32, #tpu.memory_space<vmem>>, vector<2x1x128xf32>,
    %201 = vector.extract_strided_slice %0 {offsets = [0, 0, 5], sizes = [2, 1, 1], strides = [1, 1, 1]} : vector<2x1x8xi32> to vector<2x1x1xi32>
    %202 = vector.shape_cast %201 : vector<2x1x1xi32> to vector<2x1xi32>
    %203 = vector.broadcast %202 : vector<2x1xi32> to vector<2x16xi32>
    %204 = arith.cmpi eq, %203, %4 : vector<2x16xi32>
    %205 = arith.extui %204 : vector<2x16xi1> to vector<2x16xi32>
    %206 = arith.sitofp %205 : vector<2x16xi32> to vector<2x16xf32>
    %cst_44 = arith.constant dense<0.000000e+00> : vector<2x384xf32>
    %207 = tpu.matmul %206, %1, %cst_44 {dimension_numbers = #tpu.dot_dimension_numbers<[1], [0], [0], [1], [0, 0, 1, 1], [], []>} : vector<2x16xf32>, vector<16x384xf32>, vector<2x384xf32> -> vector<2x384xf32>
    %cst_45 = arith.constant dense<0.000000e+00> : vector<2x384xf32>
    %208 = tpu.matmul %197, %2, %cst_45 {dimension_numbers = #tpu.dot_dimension_numbers<[1], [0], [0], [1], [0, 0, 1, 1], [], []>} : vector<2x128xf32>, vector<128x384xf32>, vector<2x384xf32> -> vector<2x384xf32>
    %209 = vector.broadcast %3 : vector<1x384xf32> to vector<2x384xf32>
    %210 = arith.addf %208, %209 : vector<2x384xf32>
    %211 = vector.extract_strided_slice %207 {offsets = [0, 0], sizes = [2, 128], strides = [1, 1]} : vector<2x384xf32> to vector<2x128xf32>
    %212 = vector.extract_strided_slice %207 {offsets = [0, 128], sizes = [2, 128], strides = [1, 1]} : vector<2x384xf32> to vector<2x128xf32>
    %213 = vector.extract_strided_slice %207 {offsets = [0, 256], sizes = [2, 128], strides = [1, 1]} : vector<2x384xf32> to vector<2x128xf32>
    %214 = vector.extract_strided_slice %210 {offsets = [0, 0], sizes = [2, 128], strides = [1, 1]} : vector<2x384xf32> to vector<2x128xf32>
    %215 = vector.extract_strided_slice %210 {offsets = [0, 128], sizes = [2, 128], strides = [1, 1]} : vector<2x384xf32> to vector<2x128xf32>
    %216 = vector.extract_strided_slice %210 {offsets = [0, 256], sizes = [2, 128], strides = [1, 1]} : vector<2x384xf32> to vector<2x128xf32>
    %217 = arith.addf %211, %214 : vector<2x128xf32>
    %218 = arith.negf %217 : vector<2x128xf32>
    %219 = math.exp %218 : vector<2x128xf32>
    %cst_46 = arith.constant 1.000000e+00 : f32
    %220 = vector.broadcast %cst_46 : f32 to vector<2x128xf32>
    %221 = arith.addf %220, %219 : vector<2x128xf32>
    %222 = arith.divf %220, %221 : vector<2x128xf32>
    %223 = arith.addf %212, %215 : vector<2x128xf32>
    %224 = arith.negf %223 : vector<2x128xf32>
    %225 = math.exp %224 : vector<2x128xf32>
    %cst_47 = arith.constant 1.000000e+00 : f32
    %226 = vector.broadcast %cst_47 : f32 to vector<2x128xf32>
    %227 = arith.addf %226, %225 : vector<2x128xf32>
    %228 = arith.divf %226, %227 : vector<2x128xf32>
    %229 = arith.mulf %222, %216 : vector<2x128xf32>
    %230 = arith.addf %213, %229 : vector<2x128xf32>
    %231 = math.tanh %230 : vector<2x128xf32>
    %cst_48 = arith.constant 1.000000e+00 : f32
    %232 = vector.broadcast %cst_48 : f32 to vector<2x128xf32>
    %233 = arith.subf %232, %228 : vector<2x128xf32>
    %234 = arith.mulf %233, %231 : vector<2x128xf32>
    %235 = arith.mulf %228, %197 : vector<2x128xf32>
    %236 = arith.addf %234, %235 : vector<2x128xf32>
    %c0_49 = arith.constant 0 : index
    %c5 = arith.constant 5 : index
    %c0_50 = arith.constant 0 : index
    %237 = vector.load %arg5[%c0_49, %c5, %c0_50] : memref<2x8x128xf32, #tpu.memory_space<vmem>>, vector<2x1x128xf32>
    %238 = vector.shape_cast %237 : vector<2x1x128xf32> to vector<2x128xf32>
    %239 = vector.shape_cast %236 : vector<2x128xf32> to vector<2x1x128xf32>
    tpu.vector_store %arg5[%c0_49, %c5, %c0_50], %239 {strides = array<i32>} : memref<2x8x128xf32, #tpu.memory_space<vmem>>, vector<2x1x128xf32>,
    %240 = vector.extract_strided_slice %0 {offsets = [0, 0, 6], sizes = [2, 1, 1], strides = [1, 1, 1]} : vector<2x1x8xi32> to vector<2x1x1xi32>
    %241 = vector.shape_cast %240 : vector<2x1x1xi32> to vector<2x1xi32>
    %242 = vector.broadcast %241 : vector<2x1xi32> to vector<2x16xi32>
    %243 = arith.cmpi eq, %242, %4 : vector<2x16xi32>
    %244 = arith.extui %243 : vector<2x16xi1> to vector<2x16xi32>
    %245 = arith.sitofp %244 : vector<2x16xi32> to vector<2x16xf32>
    %cst_51 = arith.constant dense<0.000000e+00> : vector<2x384xf32>
    %246 = tpu.matmul %245, %1, %cst_51 {dimension_numbers = #tpu.dot_dimension_numbers<[1], [0], [0], [1], [0, 0, 1, 1], [], []>} : vector<2x16xf32>, vector<16x384xf32>, vector<2x384xf32> -> vector<2x384xf32>
    %cst_52 = arith.constant dense<0.000000e+00> : vector<2x384xf32>
    %247 = tpu.matmul %236, %2, %cst_52 {dimension_numbers = #tpu.dot_dimension_numbers<[1], [0], [0], [1], [0, 0, 1, 1], [], []>} : vector<2x128xf32>, vector<128x384xf32>, vector<2x384xf32> -> vector<2x384xf32>
    %248 = vector.broadcast %3 : vector<1x384xf32> to vector<2x384xf32>
    %249 = arith.addf %247, %248 : vector<2x384xf32>
    %250 = vector.extract_strided_slice %246 {offsets = [0, 0], sizes = [2, 128], strides = [1, 1]} : vector<2x384xf32> to vector<2x128xf32>
    %251 = vector.extract_strided_slice %246 {offsets = [0, 128], sizes = [2, 128], strides = [1, 1]} : vector<2x384xf32> to vector<2x128xf32>
    %252 = vector.extract_strided_slice %246 {offsets = [0, 256], sizes = [2, 128], strides = [1, 1]} : vector<2x384xf32> to vector<2x128xf32>
    %253 = vector.extract_strided_slice %249 {offsets = [0, 0], sizes = [2, 128], strides = [1, 1]} : vector<2x384xf32> to vector<2x128xf32>
    %254 = vector.extract_strided_slice %249 {offsets = [0, 128], sizes = [2, 128], strides = [1, 1]} : vector<2x384xf32> to vector<2x128xf32>
    %255 = vector.extract_strided_slice %249 {offsets = [0, 256], sizes = [2, 128], strides = [1, 1]} : vector<2x384xf32> to vector<2x128xf32>
    %256 = arith.addf %250, %253 : vector<2x128xf32>
    %257 = arith.negf %256 : vector<2x128xf32>
    %258 = math.exp %257 : vector<2x128xf32>
    %cst_53 = arith.constant 1.000000e+00 : f32
    %259 = vector.broadcast %cst_53 : f32 to vector<2x128xf32>
    %260 = arith.addf %259, %258 : vector<2x128xf32>
    %261 = arith.divf %259, %260 : vector<2x128xf32>
    %262 = arith.addf %251, %254 : vector<2x128xf32>
    %263 = arith.negf %262 : vector<2x128xf32>
    %264 = math.exp %263 : vector<2x128xf32>
    %cst_54 = arith.constant 1.000000e+00 : f32
    %265 = vector.broadcast %cst_54 : f32 to vector<2x128xf32>
    %266 = arith.addf %265, %264 : vector<2x128xf32>
    %267 = arith.divf %265, %266 : vector<2x128xf32>
    %268 = arith.mulf %261, %255 : vector<2x128xf32>
    %269 = arith.addf %252, %268 : vector<2x128xf32>
    %270 = math.tanh %269 : vector<2x128xf32>
    %cst_55 = arith.constant 1.000000e+00 : f32
    %271 = vector.broadcast %cst_55 : f32 to vector<2x128xf32>
    %272 = arith.subf %271, %267 : vector<2x128xf32>
    %273 = arith.mulf %272, %270 : vector<2x128xf32>
    %274 = arith.mulf %267, %236 : vector<2x128xf32>
    %275 = arith.addf %273, %274 : vector<2x128xf32>
    %c0_56 = arith.constant 0 : index
    %c6 = arith.constant 6 : index
    %c0_57 = arith.constant 0 : index
    %276 = vector.load %arg5[%c0_56, %c6, %c0_57] : memref<2x8x128xf32, #tpu.memory_space<vmem>>, vector<2x1x128xf32>
    %277 = vector.shape_cast %276 : vector<2x1x128xf32> to vector<2x128xf32>
    %278 = vector.shape_cast %275 : vector<2x128xf32> to vector<2x1x128xf32>
    tpu.vector_store %arg5[%c0_56, %c6, %c0_57], %278 {strides = array<i32>} : memref<2x8x128xf32, #tpu.memory_space<vmem>>, vector<2x1x128xf32>,
    %279 = vector.extract_strided_slice %0 {offsets = [0, 0, 7], sizes = [2, 1, 1], strides = [1, 1, 1]} : vector<2x1x8xi32> to vector<2x1x1xi32>
    %280 = vector.shape_cast %279 : vector<2x1x1xi32> to vector<2x1xi32>
    %281 = vector.broadcast %280 : vector<2x1xi32> to vector<2x16xi32>
    %282 = arith.cmpi eq, %281, %4 : vector<2x16xi32>
    %283 = arith.extui %282 : vector<2x16xi1> to vector<2x16xi32>
    %284 = arith.sitofp %283 : vector<2x16xi32> to vector<2x16xf32>
    %cst_58 = arith.constant dense<0.000000e+00> : vector<2x384xf32>
    %285 = tpu.matmul %284, %1, %cst_58 {dimension_numbers = #tpu.dot_dimension_numbers<[1], [0], [0], [1], [0, 0, 1, 1], [], []>} : vector<2x16xf32>, vector<16x384xf32>, vector<2x384xf32> -> vector<2x384xf32>
    %cst_59 = arith.constant dense<0.000000e+00> : vector<2x384xf32>
    %286 = tpu.matmul %275, %2, %cst_59 {dimension_numbers = #tpu.dot_dimension_numbers<[1], [0], [0], [1], [0, 0, 1, 1], [], []>} : vector<2x128xf32>, vector<128x384xf32>, vector<2x384xf32> -> vector<2x384xf32>
    %287 = vector.broadcast %3 : vector<1x384xf32> to vector<2x384xf32>
    %288 = arith.addf %286, %287 : vector<2x384xf32>
    %289 = vector.extract_strided_slice %285 {offsets = [0, 0], sizes = [2, 128], strides = [1, 1]} : vector<2x384xf32> to vector<2x128xf32>
    %290 = vector.extract_strided_slice %285 {offsets = [0, 128], sizes = [2, 128], strides = [1, 1]} : vector<2x384xf32> to vector<2x128xf32>
    %291 = vector.extract_strided_slice %285 {offsets = [0, 256], sizes = [2, 128], strides = [1, 1]} : vector<2x384xf32> to vector<2x128xf32>
    %292 = vector.extract_strided_slice %288 {offsets = [0, 0], sizes = [2, 128], strides = [1, 1]} : vector<2x384xf32> to vector<2x128xf32>
    %293 = vector.extract_strided_slice %288 {offsets = [0, 128], sizes = [2, 128], strides = [1, 1]} : vector<2x384xf32> to vector<2x128xf32>
    %294 = vector.extract_strided_slice %288 {offsets = [0, 256], sizes = [2, 128], strides = [1, 1]} : vector<2x384xf32> to vector<2x128xf32>
    %295 = arith.addf %289, %292 : vector<2x128xf32>
    %296 = arith.negf %295 : vector<2x128xf32>
    %297 = math.exp %296 : vector<2x128xf32>
    %cst_60 = arith.constant 1.000000e+00 : f32
    %298 = vector.broadcast %cst_60 : f32 to vector<2x128xf32>
    %299 = arith.addf %298, %297 : vector<2x128xf32>
    %300 = arith.divf %298, %299 : vector<2x128xf32>
    %301 = arith.addf %290, %293 : vector<2x128xf32>
    %302 = arith.negf %301 : vector<2x128xf32>
    %303 = math.exp %302 : vector<2x128xf32>
    %cst_61 = arith.constant 1.000000e+00 : f32
    %304 = vector.broadcast %cst_61 : f32 to vector<2x128xf32>
    %305 = arith.addf %304, %303 : vector<2x128xf32>
    %306 = arith.divf %304, %305 : vector<2x128xf32>
    %307 = arith.mulf %300, %294 : vector<2x128xf32>
    %308 = arith.addf %291, %307 : vector<2x128xf32>
    %309 = math.tanh %308 : vector<2x128xf32>
    %cst_62 = arith.constant 1.000000e+00 : f32
    %310 = vector.broadcast %cst_62 : f32 to vector<2x128xf32>
    %311 = arith.subf %310, %306 : vector<2x128xf32>
    %312 = arith.mulf %311, %309 : vector<2x128xf32>
    %313 = arith.mulf %306, %275 : vector<2x128xf32>
    %314 = arith.addf %312, %313 : vector<2x128xf32>
    %c0_63 = arith.constant 0 : index
    %c7 = arith.constant 7 : index
    %c0_64 = arith.constant 0 : index
    %315 = vector.load %arg5[%c0_63, %c7, %c0_64] : memref<2x8x128xf32, #tpu.memory_space<vmem>>, vector<2x1x128xf32>
    %316 = vector.shape_cast %315 : vector<2x1x128xf32> to vector<2x128xf32>
    %317 = vector.shape_cast %314 : vector<2x128xf32> to vector<2x1x128xf32>
    tpu.vector_store %arg5[%c0_63, %c7, %c0_64], %317 {strides = array<i32>} : memref<2x8x128xf32, #tpu.memory_space<vmem>>, vector<2x1x128xf32>,
    %c0_65 = arith.constant 0 : index
    %c0_66 = arith.constant 0 : index
    %c0_67 = arith.constant 0 : index
    %318 = vector.load %arg6[%c0_65, %c0_66, %c0_67] : memref<2x1x128xf32, #tpu.memory_space<vmem>>, vector<2x1x128xf32>
    %319 = vector.shape_cast %318 : vector<2x1x128xf32> to vector<2x128xf32>
    %320 = vector.shape_cast %314 : vector<2x128xf32> to vector<2x1x128xf32>
    tpu.vector_store %arg6[%c0_65, %c0_66, %c0_67], %320 {strides = array<i32>} : memref<2x1x128xf32, #tpu.memory_space<vmem>>, vector<2x1x128xf32>,
    return
  }
  func.func @transform_0(%arg0: i32) -> (i32, i32, i32) {
    %c0_i32 = arith.constant 0 : i32
    %c0_i32_0 = arith.constant 0 : i32
    %c0_i32_1 = arith.constant 0 : i32
    return %arg0, %c0_i32, %c0_i32_0 : i32, i32, i32
  }
  func.func @transform_1(%arg0: i32) -> (i32, i32) {
    %c0_i32 = arith.constant 0 : i32
    %c0_i32_0 = arith.constant 0 : i32
    %c0_i32_1 = arith.constant 0 : i32
    return %c0_i32, %c0_i32_0 : i32, i32
  }
  func.func @transform_2(%arg0: i32) -> (i32, i32) {
    %c0_i32 = arith.constant 0 : i32
    %c0_i32_0 = arith.constant 0 : i32
    %c0_i32_1 = arith.constant 0 : i32
    return %c0_i32, %c0_i32_0 : i32, i32
  }
  func.func @transform_3(%arg0: i32) -> (i32, i32) {
    %c0_i32 = arith.constant 0 : i32
    %c0_i32_0 = arith.constant 0 : i32
    %c0_i32_1 = arith.constant 0 : i32
    return %c0_i32, %c0_i32_0 : i32, i32
  }
  func.func @transform_4(%arg0: i32) -> (i32, i32, i32) {
    %c0_i32 = arith.constant 0 : i32
    %c0_i32_0 = arith.constant 0 : i32
    %c0_i32_1 = arith.constant 0 : i32
    return %arg0, %c0_i32, %c0_i32_0 : i32, i32, i32
  }
  func.func @transform_5(%arg0: i32) -> (i32, i32, i32) {
    %c0_i32 = arith.constant 0 : i32
    %c0_i32_0 = arith.constant 0 : i32
    %c0_i32_1 = arith.constant 0 : i32
    return %arg0, %c0_i32, %c0_i32_0 : i32, i32, i32
  }
}

</mosaic_0001>

<bundles_post_ra>
// kernel: tpu_custom_call.1
= control target key start
LH: loop header
LB: loop body
LE: loop exit
PB: predicated region body
PF: predicated region fallthrough
CT: control target
= control target key end

     0   :  { %11 = vsyncpa [#allocation3], 0  ;;  %s3031_s0 = inlined_call_operand.hbm [shape: s32[2,1,8], index: 0, kind: input, shape index: {}]   ;;  %s3032_s1 = inlined_call_operand.hbm [shape: f32[16,384], index: 1, kind: input, shape index: {}]   ;;  %s3033_s2 = inlined_call_operand.hbm [shape: f32[128,384], index: 2, kind: input, shape index: {}]   ;;  %s3034_s3 = inlined_call_operand.hbm [shape: f32[1,384], index: 3, kind: input, shape index: {}]   ;;  %s3035_s4 = inlined_call_operand.hbm [shape: f32[2,8,128], index: 4, kind: output, shape index: {0}]   ;;  %s3036_s5 = inlined_call_operand.hbm [shape: f32[2,1,128], index: 5, kind: output, shape index: {1}]  }
   0x1   :  { %12 = vsyncpa [#allocation6], 0 }
   0x2   :  { %13 = vsyncpa [#allocation9], 0 }
   0x3   :  { %14 = vsyncpa [#allocation4], 0  ;;  %s33_s20 = sshll.u32 %s3032_s1, 4  ;;  %s34_s20 = int_to_ptr.hbm [resolvable:$true] %s33_s20 }
   0x4   :  { %15 = vsyncpa [#allocation12], 0  ;;  %s2124_s21 = smov [#allocation5]   ;;  %s20_s25 = sshll.u32 %s3031_s0, 4  ;;  %s21_s25 = int_to_ptr.hbm [resolvable:$true] %s20_s25 }
   0x5   :  { %s35_s22 = sshll.u32 %s2124_s21, 4  ;;  %s2125_s26 = smov 384   ;;  %s36_s22 = int_to_ptr.vmem [resolvable:$true] %s35_s22 }
   0x6   :  { %s2126_s27 = smov 24   ;;  %s2127_s28 = smov [#allocation2]  }
   0x7   :  { %41 = dma.hbm_to_vmem [thread:$0]  %s34_s20, 768, %s36_s22, [#allocation6], %s2125_s26, %s2125_s26, %s2126_s27  }
   0x8   :  { %s22_s29 = sshll.u32 %s2127_s28, 4  ;;  %s2128_s30 = smov 16   ;;  %s23_s29 = int_to_ptr.vmem [resolvable:$true] %s22_s29 }
   0x9   :  { %s2129_s6 = smov 1   ;;  %s46_s8 = sshll.u32 %s3033_s2, 4  ;;  %s47_s8 = int_to_ptr.hbm [resolvable:$true] %s46_s8 }
   0xa   :  { %28 = dma.hbm_to_vmem [thread:$0]  %s21_s25, 32, %s23_s29, [#allocation3], %s2128_s30, %s2128_s30, %s2129_s6  }
   0xb   :  { %s2130_s9 = smov [#allocation7]   ;;  %s60_s12 = sshll.u32 %s3034_s3, 4  ;;  %s61_s12 = int_to_ptr.hbm [resolvable:$true] %s60_s12 }
   0xc   :  { %s48_s0 = sshll.u32 %s2130_s9, 4  ;;  %s2131_s13 = smov [#allocation8]   ;;  %s49_s0 = int_to_ptr.vmem [resolvable:$true] %s48_s0 }
   0xd   :  { %54 = dma.hbm_to_vmem [thread:$0]  %s47_s8, 6144, %s49_s0, [#allocation6], %s2125_s26, %s2125_s26, %s2126_s27  }
   0xe   :  { %s62_s14 = sshll.u32 %s2131_s13, 4  ;;  %s63_s14 = int_to_ptr.vmem [resolvable:$true] %s62_s14 }
   0xf   :  { %65 = dma.hbm_to_vmem [thread:$0]  %s61_s12, 48, %s63_s14, [#allocation9]  }
  0x10   :  { %2114 = dma.done.wait [#allocation3], 32  }
  0x11   :  { %2115 = vsyncadd [#allocation3], 4294967264 }
  0x12   :  { %2116 = dma.done.wait [#allocation6], 6912  }
  0x13   :  { %2117 = vsyncadd [#allocation6], 4294960384 }
  0x14   :  { %2118 = dma.done.wait [#allocation9], 48  }
  0x15   :  { %2119 = vsyncadd [#allocation9], 4294967248  ;;  %v2132_v0 = vmov 0   ;;  %v2190_v1 = vld [vmem:[#allocation2] sm:$0x1]  ;;  %v2196_v3 = vld [vmem:[#allocation5 + $0x28] sm:$0xff]  ;;  %v139_v42 = vlaneseq }
  0x16   :  { %1820 = vset.pattern.permute.xlu0 %v2132_v0  ;;  %3101 = vst [vmem:[#allocation18_spill] sm:$0xff] %v2190_v1  ;;  %v2192_v2 = vld [vmem:[#allocation5 + $0x18] sm:$0xff]  ;;  %v2198_v4 = vld [vmem:[#allocation5] sm:$0xff]  ;;  %v2200_v5 = vld [vmem:[#allocation5 + $0x10] sm:$0xff]  ;;  %219 = vmatpush.msra.mxu3 %v2196_v3  ;;  %v2133_v19 = vmov 1   ;;  %v3041_v50 = vmov 0.0  }
  0x17   :  { %3102 = vst [vmem:[#allocation19_spill] sm:$0xff] %v2192_v2  ;;  %142 = vperm.xlu0 %1820, %v2190_v1   ;;  %179 = vmatpush.msra.mxu0 %v2192_v2  ;;  %v2203_v6 = vld [vmem:[#allocation7 + $0x168] sm:$0xff]  ;;  %v2205_v7 = vld [vmem:[#allocation7 + $0x170] sm:$0xff]  ;;  %v2209_v8 = vld [vmem:[#allocation7 + $0x158] sm:$0xff]  ;;  %v2320_v45 = vand.u32 127, %v139_v42  ;;  %vm162_vm2 = vcmask 130048  }
  0x18   :  { %3103 = vst [vmem:[#allocation20_spill] sm:$0xff] %v2205_v7  ;;  %380 = vmatpush.msra.mxu2 %v2192_v2  ;;  %220 = vmatpush.msra.mxu3 %v2200_v5  ;;  %v2213_v9 = vld [vmem:[#allocation7 + $0x150] sm:$0xff]  ;;  %v2217_v10 = vld [vmem:[#allocation2 + $0x1] sm:$0x1]  ;;  %v2222_v11 = vld [vmem:[#allocation7 + $0x138] sm:$0xff]  ;;  %s2141_s2 = smov [#allocation10]  }
  0x19   :  { %180 = vmatpush.msra.mxu0 %v2198_v4  ;;  %3104 = vst [vmem:[#allocation21_spill] sm:$0xff] %v2209_v8  ;;  %v2224_v12 = vld [vmem:[#allocation7 + $0x140] sm:$0xff]  ;;  %v2230_v14 = vld [vmem:[#allocation7 + $0x128] sm:$0xff]  ;;  %v2236_v16 = vld [vmem:[#allocation7 + $0x110] sm:$0xff]  ;;  %1821 = vset.pattern.permute.xlu1 %v2133_v19  ;;  %v2337_v54 = vrot.slane %v2320_v45, 1  ;;  %s1708_s3 = sshll.u32 %s2141_s2, 4  ;;  %s1709_s3 = int_to_ptr.vmem [resolvable:$true] %s1708_s3 }
  0x1a   :  { %232 = vmatpush.msrb.mxu3 %v2203_v6  ;;  %381 = vmatpush.msra.mxu2 %v2198_v4  ;;  %3105 = vst [vmem:[#allocation22_spill] sm:$0xff] %v2217_v10  ;;  %v2228_v13 = vld [vmem:[#allocation7 + $0x120] sm:$0xff]  ;;  %v2234_v15 = vld [vmem:[#allocation7 + $0x108] sm:$0xff]  ;;  %v2238_v17 = vld [vmem:[#allocation7 + $0xf0] sm:$0xff]  ;;  %s1710_s17 = sshll.u32 %s3035_s4, 4  ;;  %s2142_s18 = smov [#allocation11]   ;;  %s1711_s17 = int_to_ptr.hbm [resolvable:$true] %s1710_s17 }
  0x1b   :  { %252 = vmatpush.msrb.mxu0 %v2205_v7  ;;  %3106 = vst [vmem:[#allocation23_spill] sm:$0xff] %v2224_v12  ;;  %v2242_v18 = vld [vmem:[#allocation7 + $0xf8] sm:$0xff]  ;;  %v2248_v21 = vld [vmem:[#allocation7 + $0xe0] sm:$0xff]  ;;  %345 = vperm.xlu1 %1821, %v2190_v1   ;;  %v2255_v23 = vld [vmem:[#allocation7 + $0xc8] sm:$0xff]  ;;  %s1721_s19 = sshll.u32 %s2142_s18, 4  ;;  %s1723_s22 = sshll.u32 %s3036_s5, 4  ;;  %s1722_s19 = int_to_ptr.vmem [resolvable:$true] %s1721_s19  ;;  %s1724_s22 = int_to_ptr.hbm [resolvable:$true] %s1723_s22 }
  0x1c   :  { %233 = vmatpush.msrb.mxu3 %v2213_v9  ;;  %3107 = vst [vmem:[#allocation24_spill] sm:$0xff] %v2230_v14  ;;  %v2246_v20 = vld [vmem:[#allocation7 + $0xd8] sm:$0xff]  ;;  %v2253_v22 = vld [vmem:[#allocation7 + $0xc0] sm:$0xff]  ;;  %v2259_v24 = vld [vmem:[#allocation7 + $0xa8] sm:$0xff]  ;;  %s2143_s23 = smov 128   ;;  %s2144_s24 = smov 8  }
  0x1d   :  { %253 = vmatpush.msrb.mxu0 %v2209_v8  ;;  %3108 = vst [vmem:[#allocation25_spill] sm:$0xff] %v2236_v16  ;;  %v2261_v25 = vld [vmem:[#allocation7 + $0xb0] sm:$0xff]  ;;  %v2267_v27 = vld [vmem:[#allocation7 + $0x98] sm:$0xff]  ;;  %v2275_v30 = vld [vmem:[#allocation7 + $0x80] sm:$0xff] }
  0x1e   :  { %234 = vmatpush.msrb.mxu3 %v2222_v11  ;;  %3109 = vst [vmem:[#allocation26_spill] sm:$0xff] %v2242_v18  ;;  %v2265_v26 = vld [vmem:[#allocation7 + $0x90] sm:$0xff]  ;;  %v2273_v29 = vld [vmem:[#allocation7 + $0x78] sm:$0xff]  ;;  %v2283_v32 = vld [vmem:[#allocation7 + $0x60] sm:$0xff] }
  0x1f   :  { %146 = vperm.xlu0 %1820, %v2217_v10   ;;  %254 = vmatpush.msrb.mxu0 %v2224_v12  ;;  %3110 = vst [vmem:[#allocation27_spill] sm:$0xff] %v2248_v21  ;;  %v2271_v28 = vld [vmem:[#allocation5 + $0x20] sm:$0xff]  ;;  %v2281_v31 = vld [vmem:[#allocation5 + $0x8] sm:$0xff]  ;;  %v2285_v33 = vld [vmem:[#allocation7 + $0x68] sm:$0xff] }
  0x20   :  { %235 = vmatpush.msrb.mxu3 %v2228_v13  ;;  %3111 = vst [vmem:[#allocation28_spill] sm:$0xff] %v2255_v23  ;;  %199 = vmatpush.msra.mxu1 %v2271_v28  ;;  %v2291_v34 = vld [vmem:[#allocation7 + $0x48] sm:$0xff]  ;;  %v2293_v35 = vld [vmem:[#allocation7 + $0x50] sm:$0xff]  ;;  %v2299_v37 = vld [vmem:[#allocation7 + $0x38] sm:$0xff] }
  0x21   :  { %255 = vmatpush.msrb.mxu0 %v2230_v14  ;;  %3112 = vst [vmem:[#allocation29_spill] sm:$0xff] %v2261_v25  ;;  %400 = vmatpush.msrb.mxu2 %v2271_v28  ;;  %v2295_v36 = vld [vmem:[#allocation7 + $0x30] sm:$0xff]  ;;  %v2301_v38 = vld [vmem:[#allocation7 + $0x18] sm:$0xff]  ;;  %v2303_v39 = vld [vmem:[#allocation7 + $0x20] sm:$0xff] }
  0x22   :  { %236 = vmatpush.msrb.mxu3 %v2234_v15  ;;  %3113 = vst [vmem:[#allocation30_spill] sm:$0xff] %v2267_v27  ;;  %200 = vmatpush.msra.mxu1 %v2281_v31  ;;  %v2308_v40 = vld [vmem:[#allocation7] sm:$0xff]  ;;  %v2310_v41 = vld [vmem:[#allocation7 + $0x8] sm:$0xff]  ;;  %v2316_v43 = vld [vmem:[#allocation7 + $0x178] sm:$0xff] }
  0x23   :  { %256 = vmatpush.msrb.mxu0 %v2236_v16  ;;  %3114 = vst [vmem:[#allocation31_spill] sm:$0xff] %v2271_v28  ;;  %349 = vperm.xlu1 %1821, %v2217_v10   ;;  %v2318_v44 = vld [vmem:[#allocation7 + $0x160] sm:$0xff]  ;;  %v2323_v47 = vld [vmem:[#allocation7 + $0x148] sm:$0xff]  ;;  %v2326_v49 = vld [vmem:[#allocation7 + $0x130] sm:$0xff] }
  0x24   :  { %237 = vmatpush.msrb.mxu3 %v2238_v17  ;;  %3115 = vst [vmem:[#allocation32_spill] sm:$0xff] %v2275_v30  ;;  %401 = vmatpush.msrb.mxu2 %v2281_v31  ;;  %v2331_v52 = vld [vmem:[#allocation7 + $0x118] sm:$0xff]  ;;  %v2334_v53 = vld [vmem:[#allocation7 + $0x100] sm:$0xff]  ;;  %v2340_v56 = vld [vmem:[#allocation7 + $0xe8] sm:$0xff] }
  0x25   :  { %257 = vmatpush.msrb.mxu0 %v2242_v18  ;;  %3116 = vst [vmem:[#allocation33_spill] sm:$0xff] %v2281_v31  ;;  %272 = vmatpush.msrb.mxu1 %v2316_v43  ;;  %v2343_v58 = vld [vmem:[#allocation7 + $0xd0] sm:$0xff]  ;;  %v2348_v60 = vld [vmem:[#allocation7 + $0xb8] sm:$0xff]  ;;  %v2351_v61 = vld [vmem:[#allocation7 + $0xa0] sm:$0xff] }
  0x26   :  { %238 = vmatpush.msrb.mxu3 %v2246_v20  ;;  %3117 = vst [vmem:[#allocation34_spill] sm:$0xff] %v2285_v33  ;;  %v2354_v62 = vld [vmem:[#allocation7 + $0x88] sm:$0xff]  ;;  %v2358_v63 = vld [vmem:[#allocation7 + $0x70] sm:$0xff]  ;;  %v2362_v19 = vld [vmem:[#allocation7 + $0x58] sm:$0xff] }
  0x27   :  { %258 = vmatpush.msrb.mxu0 %v2248_v21  ;;  %3118 = vst [vmem:[#allocation35_spill] sm:$0xff] %v2293_v35  ;;  %273 = vmatpush.msrb.mxu1 %v2318_v44  ;;  %v2366_v42 = vld [vmem:[#allocation7 + $0x40] sm:$0xff] }
  0x28   :  { %239 = vmatpush.msrb.mxu3 %v2253_v22  ;;  %3119 = vst [vmem:[#allocation36_spill] sm:$0xff] %v2299_v37 }
  0x29   :  { %259 = vmatpush.msrb.mxu0 %v2255_v23  ;;  %3120 = vst [vmem:[#allocation37_spill] sm:$0xff] %v2301_v38  ;;  %274 = vmatpush.msrb.mxu1 %v2323_v47 }
  0x2a   :  { %240 = vmatpush.msrb.mxu3 %v2259_v24  ;;  %3121 = vst [vmem:[#allocation38_spill] sm:$0xff] %v2303_v39 }
  0x2b   :  { %260 = vmatpush.msrb.mxu0 %v2261_v25  ;;  %3122 = vst [vmem:[#allocation39_spill] sm:$0xff] %v2308_v40  ;;  %275 = vmatpush.msrb.mxu1 %v2326_v49 }
  0x2c   :  { %241 = vmatpush.msrb.mxu3 %v2265_v26  ;;  %3123 = vst [vmem:[#allocation40_spill] sm:$0xff] %v2310_v41 }
  0x2d   :  { %261 = vmatpush.msrb.mxu0 %v2267_v27  ;;  %276 = vmatpush.msrb.mxu1 %v2331_v52 }
  0x2e   :  { %242 = vmatpush.msrb.mxu3 %v2273_v29 }
  0x2f   :  { %262 = vmatpush.msrb.mxu0 %v2275_v30  ;;  %277 = vmatpush.msrb.mxu1 %v2334_v53 }
  0x30   :  { %243 = vmatpush.msrb.mxu3 %v2283_v32 }
  0x31   :  { %263 = vmatpush.msrb.mxu0 %v2285_v33  ;;  %278 = vmatpush.msrb.mxu1 %v2340_v56 }
  0x32   :  { %244 = vmatpush.msrb.mxu3 %v2291_v34 }
  0x33   :  { %264 = vmatpush.msrb.mxu0 %v2293_v35  ;;  %279 = vmatpush.msrb.mxu1 %v2343_v58 }
  0x34   :  { %245 = vmatpush.msrb.mxu3 %v2295_v36 }
  0x35   :  { %265 = vmatpush.msrb.mxu0 %v2299_v37  ;;  %280 = vmatpush.msrb.mxu1 %v2348_v60 }
  0x36   :  { %246 = vmatpush.msrb.mxu3 %v2301_v38 }
  0x37   :  { %266 = vmatpush.msrb.mxu0 %v2303_v39  ;;  %281 = vmatpush.msrb.mxu1 %v2351_v61 }
  0x38   :  { %247 = vmatpush.msrb.mxu3 %v2308_v40 }
  0x39   :  { %267 = vmatpush.msrb.mxu0 %v2310_v41  ;;  %282 = vmatpush.msrb.mxu1 %v2354_v62 }
  0x3b   :  { %283 = vmatpush.msrb.mxu1 %v2358_v63 }
  0x3d   :  { %284 = vmatpush.msrb.mxu1 %v2362_v19 }
  0x3f   :  { %285 = vmatpush.msrb.mxu1 %v2366_v42 }
  0x89   :  { %v143_v46 = vpop.permute.xlu0 %142 }
  0x8a   :  { %v144_v48 = vperm.slane %v143_v46, 0  ;;  %v2371_v46 = vld [vmem:[#allocation7 + $0x28] sm:$0xff] }
  0x8b   :  { %286 = vmatpush.msrb.mxu1 %v2371_v46 }
  0x8c   :  { %vm150_vm0 = vcmp.eq.s32.totalorder %v144_v48, %v2320_v45  ;;  %v2376_v48 = vld [vmem:[#allocation7 + $0x10] sm:$0xff] }
  0x8d   :  { %v1743_v51 = vsel %vm150_vm0, 1.0, %v3041_v50  ;;  %3124 = vst [vmem:[#allocation41_spill] sm:$0xff] %v2376_v48  ;;  %287 = vmatpush.msrb.mxu1 %v2376_v48 }
  0x8e   :  { %158 = vst [vmem:[#allocation1] ss:$9 sm:$0xff] %v1743_v51  ;;  %v346_v51 = vpop.permute.xlu1 %345 }
  0x91   :  { %v147_v55 = vpop.permute.xlu0 %146 }
  0x92   :  { %v148_v57 = vperm.slane %v147_v55, 0  ;;  %v347_v55 = vperm.slane %v346_v51, 0 }
  0x94   :  { %vm151_vm1 = vcmp.eq.s32.totalorder %v148_v57, %v2337_v54  ;;  %vm352_vm3 = vcmp.eq.s32.totalorder %v347_v55, %v2320_v45 }
  0x95   :  { %v1744_v59 = vsel %vm151_vm1, 1.0, %v3041_v50  ;;  %v1750_v57 = vsel %vm352_vm3, 1.0, %v3041_v50 }
  0x96   :  { %160 = vst [vmem:[#allocation1 + $0x1] ss:$9 sm:$0xff] %v1744_v59  ;;  %v350_v59 = vpop.permute.xlu1 %349 }
  0x9d   :  { %v161_v0 = vld [vmem:[#allocation1] sm:$0xff] }
  0x9e   :  { %1745 = vmatmul.msk.f32.vlgmr.msra.gmra.mxu0 %vm162_vm2, %v161_v0  ;;  %1746 = vmatmul.msk.f32.vlgmr.msra.gmra.mxu1 %vm162_vm2, %v161_v0  ;;  %360 = vst [vmem:[#allocation1] ss:$9 sm:$0xff] %v1750_v57 }
  0x9f   :  { %1747 = vmatmul.msk.f32.vlgmr.msra.gmra.mxu3 %vm162_vm2, %v161_v0  ;;  %466 = vmatpush.msra.mxu0 %v2316_v43  ;;  %v351_v0 = vperm.slane %v350_v59, 0 }
  0xa0   :  { %446 = vmatpush.msra.mxu3 %v2205_v7  ;;  %594 = vmatpush.msra.mxu1 %v2271_v28 }
  0xa1   :  { %467 = vmatpush.msra.mxu0 %v2318_v44  ;;  %vm353_vm4 = vcmp.eq.s32.totalorder %v351_v0, %v2337_v54 }
  0xa2   :  { %447 = vmatpush.msra.mxu3 %v2209_v8  ;;  %595 = vmatpush.msra.mxu1 %v2281_v31 }
  0xa3   :  { %468 = vmatpush.msra.mxu0 %v2323_v47 }
  0xa4   :  { %448 = vmatpush.msra.mxu3 %v2224_v12 }
  0xa5   :  { %469 = vmatpush.msra.mxu0 %v2326_v49 }
  0xa6   :  { %268 = vmatmul.f32.vlgmr.msrb.gmra.mxu0 %v3041_v50  ;;  %449 = vmatpush.msra.mxu3 %v2230_v14 }
  0xa7   :  { %248 = vmatmul.f32.vlgmr.msrb.gmra.mxu3 %v3041_v50  ;;  %288 = vmatmul.f32.vlgmr.msrb.gmra.mxu1 %v3041_v50 }
  0xa8   :  { %450 = vmatpush.msra.mxu3 %v2236_v16  ;;  %470 = vmatpush.msra.mxu0 %v2331_v52 }
  0xa9   :  { %614 = vmatpush.msrb.mxu1 %v2196_v3 }
  0xaa   :  { %451 = vmatpush.msra.mxu3 %v2242_v18  ;;  %471 = vmatpush.msra.mxu0 %v2334_v53 }
  0xab   :  { %615 = vmatpush.msrb.mxu1 %v2200_v5 }
  0xac   :  { %452 = vmatpush.msra.mxu3 %v2248_v21  ;;  %472 = vmatpush.msra.mxu0 %v2340_v56 }
  0xae   :  { %453 = vmatpush.msra.mxu3 %v2255_v23  ;;  %473 = vmatpush.msra.mxu0 %v2343_v58 }
  0xb0   :  { %454 = vmatpush.msra.mxu3 %v2261_v25  ;;  %474 = vmatpush.msra.mxu0 %v2348_v60 }
  0xb2   :  { %455 = vmatpush.msra.mxu3 %v2267_v27  ;;  %475 = vmatpush.msra.mxu0 %v2351_v61 }
  0xb4   :  { %456 = vmatpush.msra.mxu3 %v2275_v30  ;;  %476 = vmatpush.msra.mxu0 %v2354_v62 }
  0xb6   :  { %457 = vmatpush.msra.mxu3 %v2285_v33  ;;  %477 = vmatpush.msra.mxu0 %v2358_v63 }
  0xb8   :  { %458 = vmatpush.msra.mxu3 %v2293_v35  ;;  %478 = vmatpush.msra.mxu0 %v2362_v19 }
  0xba   :  { %459 = vmatpush.msra.mxu3 %v2299_v37  ;;  %479 = vmatpush.msra.mxu0 %v2366_v42 }
  0xbc   :  { %460 = vmatpush.msra.mxu3 %v2303_v39  ;;  %480 = vmatpush.msra.mxu0 %v2371_v46 }
  0xbe   :  { %461 = vmatpush.msra.mxu3 %v2310_v41  ;;  %481 = vmatpush.msra.mxu0 %v2376_v48  ;;  %v1751_v48 = vsel %vm353_vm4, 1.0, %v3041_v50 }
  0xbf   :  { %362 = vst [vmem:[#allocation1 + $0x1] ss:$9 sm:$0xff] %v1751_v48 }
  0xc0   :  { %574 = vmatpush.msrb.mxu3 %v2192_v2  ;;  %788 = vmatpush.msrb.mxu0 %v2271_v28 }
  0xc2   :  { %575 = vmatpush.msrb.mxu3 %v2198_v4  ;;  %789 = vmatpush.msrb.mxu0 %v2281_v31 }
  0xc6   :  { %v363_v2 = vld [vmem:[#allocation1] sm:$0xff] }
  0xc7   :  { %1752 = vmatmul.msk.f32.vlgmr.msra.gmra.mxu2 %vm162_vm2, %v363_v2 }
  0xc8   :  { %420 = vmatpush.msra.mxu2 %v2196_v3 }
  0xca   :  { %421 = vmatpush.msra.mxu2 %v2200_v5 }
  0xcf   :  { %1753 = vmatmul.msk.f32.vlgmr.msrb.gmra.mxu2 %vm162_vm2, %v363_v2 }
  0xd0   :  { %426 = vmatpush.msrb.mxu2 %v2203_v6 }
  0xd2   :  { %427 = vmatpush.msrb.mxu2 %v2213_v9 }
  0xd4   :  { %428 = vmatpush.msrb.mxu2 %v2222_v11 }
  0xd6   :  { %429 = vmatpush.msrb.mxu2 %v2228_v13 }
  0xd7   :  { %1754 = vmatmul.msk.f32.vlgmr.msra.gmra.mxu2 %vm162_vm2, %v363_v2  ;;  %v138_v2 = vld [vmem:[#allocation8] sm:$0x7] }
  0xd8   :  { %430 = vmatpush.msrb.mxu2 %v2234_v15  ;;  %v2442_v51 = vperm.slane %v138_v2, 1  ;;  %v2451_v31 = vperm.slane %v138_v2, 0 }
  0xda   :  { %431 = vmatpush.msrb.mxu2 %v2238_v17  ;;  %3125 = vst [vmem:[#allocation42_spill] sm:$0xff] %v2442_v51 }
  0xdc   :  { %432 = vmatpush.msrb.mxu2 %v2246_v20 }
  0xde   :  { %433 = vmatpush.msrb.mxu2 %v2253_v22 }
  0xe0   :  { %434 = vmatpush.msrb.mxu2 %v2259_v24 }
  0xe2   :  { %435 = vmatpush.msrb.mxu2 %v2265_v26 }
  0xe4   :  { %436 = vmatpush.msrb.mxu2 %v2273_v29 }
  0xe6   :  { %437 = vmatpush.msrb.mxu2 %v2283_v32 }
  0xe8   :  { %438 = vmatpush.msrb.mxu2 %v2291_v34 }
  0xea   :  { %439 = vmatpush.msrb.mxu2 %v2295_v36 }
  0xec   :  { %440 = vmatpush.msrb.mxu2 %v2301_v38 }
  0xee   :  { %441 = vmatpush.msrb.mxu2 %v2308_v40 }
  0xf0   :  { %640 = vmatpush.msra.mxu2 %v2205_v7 }
  0xf2   :  { %641 = vmatpush.msra.mxu2 %v2209_v8 }
  0xf4   :  { %642 = vmatpush.msra.mxu2 %v2224_v12 }
  0xf6   :  { %643 = vmatpush.msra.mxu2 %v2230_v14 }
  0xf8   :  { %644 = vmatpush.msra.mxu2 %v2236_v16 }
  0xfa   :  { %645 = vmatpush.msra.mxu2 %v2242_v18 }
  0xfc   :  { %646 = vmatpush.msra.mxu2 %v2248_v21 }
  0xfe   :  { %647 = vmatpush.msra.mxu2 %v2255_v23 }
 0x100   :  { %648 = vmatpush.msra.mxu2 %v2261_v25 }
 0x102   :  { %649 = vmatpush.msra.mxu2 %v2267_v27 }
 0x104   :  { %650 = vmatpush.msra.mxu2 %v2275_v30 }
 0x106   :  { %651 = vmatpush.msra.mxu2 %v2285_v33 }
 0x108   :  { %652 = vmatpush.msra.mxu2 %v2293_v35 }
 0x10a   :  { %653 = vmatpush.msra.mxu2 %v2299_v37 }
 0x10c   :  { %654 = vmatpush.msra.mxu2 %v2303_v39 }
 0x10e   :  { %655 = vmatpush.msra.mxu2 %v2310_v41 }
 0x11b   :  { %v182_v48 = vpop.f32.mrf.mxu0  ;;  %v202_v0 = vpop.f32.mrf.mxu1 }
 0x122   :  { %v2445_v55 = vpop.f32.mrf.mxu3 }
 0x123   :  { %v269_v57 = vpop.f32.mrf.mxu0 }
 0x124   :  { %v270_v59 = vadd.f32 %v269_v57, %v2442_v51  ;;  %v289_v30 = vpop.f32.mrf.mxu1 }
 0x126   :  { %v312_v50 = vadd.f32 %v270_v59, %v202_v0 }
 0x128   :  { %v1749_v28 = vmul.f32 -1.442695, %v312_v50 }
 0x12a   :  { %1834 = vpow2.f32 %v1749_v28  ;;  %v249_v38 = vpop.f32.mrf.mxu3 }
 0x12b   :  { %v250_v40 = vadd.f32 %v249_v38, %v2451_v31 }
 0x12d   :  { %v292_v7 = vadd.f32 %v250_v40, %v182_v48  ;;  %v2135_v40 = vmov 2  }
 0x12e   :  { %1822 = vset.pattern.permute.xlu2 %v2135_v40 }
 0x12f   :  { %v1748_v57 = vmul.f32 -1.442695, %v292_v7  ;;  %539 = vperm.xlu2 %1822, %v2190_v1  }
 0x130   :  { %v1835_v59 = vpop.eup %1834 }
 0x131   :  { %v316_v0 = vadd.f32 1.0, %v1835_v59  ;;  %1836 = vpow2.f32 %v1748_v57 }
 0x133   :  { %1838 = vrcp.f32 %v316_v0  ;;  %vm322_vm10 = vweird.f32 %v316_v0 }
 0x137   :  { %v1837_v28 = vpop.eup %1836  ;;  %543 = vperm.xlu2 %1822, %v2217_v10  }
 0x138   :  { %v296_v38 = vadd.f32 1.0, %v1837_v28  ;;  %v2469_v28 = vperm.slane %v138_v2, 2 }
 0x139   :  { %v1839_v7 = vpop.eup %1838 }
 0x13a   :  { %1840 = vrcp.f32 %v296_v38  ;;  %v318_v50 = vmul.f32 %v1839_v7, %v316_v0  ;;  %v308_v27 = vand.u32 2147483648, %v296_v38  ;;  %v306_v40 = vand.u32 2147483647, %v296_v38 }
 0x13b   :  { %v290_v37 = vadd.f32 %v289_v30, %v2469_v28  ;;  %vm302_vm6 = vweird.f32 %v296_v38  ;;  %vm323_vm9 = vweird.f32 %v1839_v7 }
 0x13c   :  { %v319_v59 = vsub.f32 1.0, %v318_v50  ;;  %v309_v39 = vor.u32 1.1754944e-38, %v308_v27  ;;  %vm307_vm8 = vcmp.eq.f32.partialorder %v306_v40, 8.507059e+37  ;;  %vm324_vm11 = vmor %vm322_vm10, %vm323_vm9 }
 0x13e   :  { %v320_v25 = vmul.f32 %v1839_v7, %v319_v59 }
 0x140   :  { %v1841_v48 = vpop.eup %1840  ;;  %v321_v50 = vadd.f32 %v1839_v7, %v320_v25 }
 0x141   :  { %v298_v57 = vmul.f32 %v1841_v48, %v296_v38  ;;  %vm303_vm5 = vweird.f32 %v1841_v48 }
 0x142   :  { %vm304_vm7 = vmor %vm302_vm6, %vm303_vm5  ;;  %v325_v21 = vsel %vm324_vm11, %v1839_v7, %v321_v50  ;;  %v3129_v50 = vld [vmem:[#allocation37_spill] sm:$0xff] }
 0x143   :  { %v299_v33 = vsub.f32 1.0, %v298_v57  ;;  %v328_v57 = vand.u32 2147483648, %v316_v0 }
 0x145   :  { %v300_v35 = vmul.f32 %v1841_v48, %v299_v33  ;;  %v326_v33 = vand.u32 2147483647, %v316_v0  ;;  %v329_v10 = vor.u32 1.1754944e-38, %v328_v57  ;;  %v3128_v0 = vld [vmem:[#allocation19_spill] sm:$0xff] }
 0x147   :  { %v301_v1 = vadd.f32 %v1841_v48, %v300_v35  ;;  %vm327_vm12 = vcmp.eq.f32.partialorder %v326_v33, 8.507059e+37 }
 0x148   :  { %v330_v30 = vsel %vm327_vm12, %v329_v10, %v325_v21  ;;  %v3127_v21 = vmov 0.0  }
 0x149   :  { %v305_v23 = vsel %vm304_vm7, %v1841_v48, %v301_v1  ;;  %v335_v35 = vsub.f32 1.0, %v330_v30  ;;  %v337_v1 = vmul.f32 0.0, %v330_v30 }
 0x14a   :  { %v310_v2 = vsel %vm307_vm8, %v309_v39, %v305_v23  ;;  %v383_v7 = vpop.f32.mrf.mxu2 }
 0x14b   :  { %v332_v41 = vmul.f32 %v310_v2, %v290_v37 }
 0x14d   :  { %v333_v59 = vadd.f32 %v332_v41, %v2445_v55 }
 0x14f   :  { %1842 = vtanh.f32 %v333_v59 }
 0x152   :  { %v403_v40 = vpop.f32.mrf.mxu2 }
 0x155   :  { %v1843_v38 = vpop.eup %1842 }
 0x156   :  { %v336_v27 = vmul.f32 %v1843_v38, %v335_v35  ;;  %v3130_v35 = vld [vmem:[#allocation39_spill] sm:$0xff]  ;;  %v3131_v38 = vld [vmem:[#allocation20_spill] sm:$0xff] }
 0x158   :  { %v2474_v48 = vadd.f32 %v337_v1, %v336_v27 }
 0x15a   :  { %v340_v23 = vrot.slane %v2474_v48, 1  ;;  %342 = vst [vmem:[#allocation10] sm:$0x1] %v2474_v48  ;;  %442 = vmatmul.f32.vlgmr.msrb.gmra.mxu2 %v2474_v48  ;;  %462 = vmatmul.f32.vlgmr.msra.gmra.mxu3 %v2474_v48  ;;  %v2535_v2 = vpop.f32.mrf.mxu2 }
 0x15b   :  { %482 = vmatmul.f32.vlgmr.msra.gmra.mxu0 %v2474_v48  ;;  %660 = vmatpush.msra.mxu3 %v2316_v43 }
 0x15c   :  { %343 = vst [vmem:[#allocation10 + $0x8] sm:$0x1] %v340_v23  ;;  %808 = vmatpush.msra.mxu0 %v2196_v3  ;;  %854 = vmatpush.msrb.mxu2 %v2316_v43  ;;  %v3126_v3 = vld [vmem:[#allocation41_spill] sm:$0xff] }
 0x15d   :  { %661 = vmatpush.msra.mxu3 %v2318_v44 }
 0x15e   :  { %809 = vmatpush.msra.mxu0 %v2200_v5  ;;  %855 = vmatpush.msrb.mxu2 %v2318_v44 }
 0x15f   :  { %662 = vmatpush.msra.mxu3 %v2323_v47 }
 0x160   :  { %856 = vmatpush.msrb.mxu2 %v2323_v47 }
 0x161   :  { %663 = vmatpush.msra.mxu3 %v2326_v49 }
 0x162   :  { %857 = vmatpush.msrb.mxu2 %v2326_v49 }
 0x163   :  { %664 = vmatpush.msra.mxu3 %v2331_v52 }
 0x164   :  { %858 = vmatpush.msrb.mxu2 %v2331_v52 }
 0x165   :  { %665 = vmatpush.msra.mxu3 %v2334_v53 }
 0x166   :  { %859 = vmatpush.msrb.mxu2 %v2334_v53 }
 0x167   :  { %666 = vmatpush.msra.mxu3 %v2340_v56 }
 0x168   :  { %860 = vmatpush.msrb.mxu2 %v2340_v56 }
 0x169   :  { %667 = vmatpush.msra.mxu3 %v2343_v58 }
 0x16a   :  { %861 = vmatpush.msrb.mxu2 %v2343_v58 }
 0x16b   :  { %668 = vmatpush.msra.mxu3 %v2348_v60 }
 0x16c   :  { %862 = vmatpush.msrb.mxu2 %v2348_v60 }
 0x16d   :  { %669 = vmatpush.msra.mxu3 %v2351_v61 }
 0x16e   :  { %863 = vmatpush.msrb.mxu2 %v2351_v61 }
 0x16f   :  { %670 = vmatpush.msra.mxu3 %v2354_v62 }
 0x170   :  { %864 = vmatpush.msrb.mxu2 %v2354_v62 }
 0x171   :  { %671 = vmatpush.msra.mxu3 %v2358_v63 }
 0x172   :  { %865 = vmatpush.msrb.mxu2 %v2358_v63 }
 0x173   :  { %672 = vmatpush.msra.mxu3 %v2362_v19 }
 0x174   :  { %866 = vmatpush.msrb.mxu2 %v2362_v19 }
 0x175   :  { %673 = vmatpush.msra.mxu3 %v2366_v42 }
 0x176   :  { %867 = vmatpush.msrb.mxu2 %v2366_v42 }
 0x177   :  { %674 = vmatpush.msra.mxu3 %v2371_v46 }
 0x178   :  { %868 = vmatpush.msrb.mxu2 %v2371_v46 }
 0x179   :  { %675 = vmatpush.msra.mxu3 %v3126_v3 }
 0x17a   :  { %869 = vmatpush.msrb.mxu2 %v3126_v3 }
 0x189   :  { %v540_v5 = vpop.permute.xlu2 %539 }
 0x18a   :  { %v541_v10 = vperm.slane %v540_v5, 0 }
 0x18c   :  { %vm546_vm13 = vcmp.eq.s32.totalorder %v541_v10, %v2320_v45 }
 0x18d   :  { %v1757_v25 = vsel %vm546_vm13, 1.0, %v3127_v21 }
 0x18e   :  { %554 = vst [vmem:[#allocation1] ss:$9 sm:$0xff] %v1757_v25 }
 0x191   :  { %v544_v37 = vpop.permute.xlu2 %543 }
 0x192   :  { %v545_v39 = vperm.slane %v544_v37, 0 }
 0x194   :  { %vm547_vm14 = vcmp.eq.s32.totalorder %v545_v39, %v2337_v54  ;;  %v3132_v39 = vld [vmem:[#allocation27_spill] sm:$0xff] }
 0x195   :  { %v1758_v41 = vsel %vm547_vm14, 1.0, %v3127_v21 }
 0x196   :  { %556 = vst [vmem:[#allocation1 + $0x1] ss:$9 sm:$0xff] %v1758_v41 }
 0x19d   :  { %v557_v55 = vld [vmem:[#allocation1] sm:$0xff] }
 0x19e   :  { %1760 = vmatmul.msk.f32.vlgmr.msra.gmra.mxu1 %vm162_vm2, %v557_v55  ;;  %1759 = vmatmul.msk.f32.vlgmr.msrb.gmra.mxu3 %vm162_vm2, %v557_v55 }
 0x19f   :  { %620 = vmatpush.msra.mxu1 %v2203_v6  ;;  %768 = vmatpush.msrb.mxu3 %v3128_v0 }
 0x1a1   :  { %621 = vmatpush.msra.mxu1 %v2213_v9  ;;  %769 = vmatpush.msrb.mxu3 %v2198_v4 }
 0x1a3   :  { %622 = vmatpush.msra.mxu1 %v2222_v11 }
 0x1a5   :  { %623 = vmatpush.msra.mxu1 %v2228_v13 }
 0x1a6   :  { %1761 = vmatmul.msk.f32.vlgmr.msrb.gmra.mxu1 %vm162_vm2, %v557_v55  ;;  %v3133_v55 = vld [vmem:[#allocation28_spill] sm:$0xff] }
 0x1a7   :  { %624 = vmatpush.msra.mxu1 %v2234_v15 }
 0x1a9   :  { %625 = vmatpush.msra.mxu1 %v2238_v17 }
 0x1ab   :  { %626 = vmatpush.msra.mxu1 %v2246_v20 }
 0x1ad   :  { %627 = vmatpush.msra.mxu1 %v2253_v22 }
 0x1af   :  { %628 = vmatpush.msra.mxu1 %v2259_v24 }
 0x1b1   :  { %629 = vmatpush.msra.mxu1 %v2265_v26 }
 0x1b3   :  { %630 = vmatpush.msra.mxu1 %v2273_v29 }
 0x1b5   :  { %631 = vmatpush.msra.mxu1 %v2283_v32 }
 0x1b7   :  { %632 = vmatpush.msra.mxu1 %v2291_v34 }
 0x1b9   :  { %633 = vmatpush.msra.mxu1 %v2295_v36 }
 0x1bb   :  { %634 = vmatpush.msra.mxu1 %v3129_v50 }
 0x1bd   :  { %635 = vmatpush.msra.mxu1 %v3130_v35 }
 0x1bf   :  { %834 = vmatpush.msrb.mxu1 %v3131_v38 }
 0x1c1   :  { %835 = vmatpush.msrb.mxu1 %v2209_v8 }
 0x1c3   :  { %836 = vmatpush.msrb.mxu1 %v2224_v12 }
 0x1c5   :  { %837 = vmatpush.msrb.mxu1 %v2230_v14 }
 0x1c7   :  { %838 = vmatpush.msrb.mxu1 %v2236_v16 }
 0x1c9   :  { %839 = vmatpush.msrb.mxu1 %v2242_v18  ;;  %v3140_v18 = vld [vmem:[#allocation35_spill] sm:$0xff] }
 0x1cb   :  { %840 = vmatpush.msrb.mxu1 %v3132_v39 }
 0x1cd   :  { %841 = vmatpush.msrb.mxu1 %v3133_v55 }
 0x1d8   :  { %v483_v16 = vpop.f32.mrf.mxu0 }
 0x1dd   :  { %v443_v57 = vpop.f32.mrf.mxu2  ;;  %v463_v33 = vpop.f32.mrf.mxu3 }
 0x1de   :  { %v444_v59 = vadd.f32 %v443_v57, %v2451_v31  ;;  %v464_v30 = vadd.f32 %v463_v33, %v2442_v51  ;;  %v3135_v57 = vld [vmem:[#allocation22_spill] sm:$0xff] }
 0x1df   :  { %v3136_v33 = vld [vmem:[#allocation18_spill] sm:$0xff] }
 0x1e0   :  { %v486_v27 = vadd.f32 %v444_v59, %v383_v7  ;;  %v506_v1 = vadd.f32 %v464_v30, %v403_v40  ;;  %v3134_v7 = vld [vmem:[#allocation29_spill] sm:$0xff]  ;;  %v2136_v40 = vmov 3   ;;  %v3137_v59 = vld [vmem:[#allocation30_spill] sm:$0xff] }
 0x1e1   :  { %842 = vmatpush.msrb.mxu1 %v3134_v7  ;;  %1824 = vset.pattern.permute.xlu1 %v2136_v40 }
 0x1e2   :  { %v1755_v23 = vmul.f32 -1.442695, %v486_v27  ;;  %v1756_v5 = vmul.f32 -1.442695, %v506_v1  ;;  %1823 = vset.pattern.permute.xlu0 %v2136_v40  ;;  %737 = vperm.xlu1 %1824, %v3135_v57  }
 0x1e3   :  { %733 = vperm.xlu0 %1823, %v3136_v33   ;;  %843 = vmatpush.msrb.mxu1 %v3137_v59  ;;  %v3141_v59 = vld [vmem:[#allocation36_spill] sm:$0xff] }
 0x1e4   :  { %1844 = vpow2.f32 %v1755_v23  ;;  %v3138_v23 = vld [vmem:[#allocation32_spill] sm:$0xff] }
 0x1e5   :  { %1846 = vpow2.f32 %v1756_v5  ;;  %844 = vmatpush.msrb.mxu1 %v3138_v23  ;;  %v484_v23 = vadd.f32 %v483_v16, %v2469_v28 }
 0x1ea   :  { %v1845_v10 = vpop.eup %1844 }
 0x1eb   :  { %v1847_v25 = vpop.eup %1846  ;;  %v490_v37 = vadd.f32 1.0, %v1845_v10 }
 0x1ec   :  { %v510_v41 = vadd.f32 1.0, %v1847_v25  ;;  %v3139_v25 = vld [vmem:[#allocation34_spill] sm:$0xff] }
 0x1ed   :  { %1848 = vrcp.f32 %v490_v37  ;;  %845 = vmatpush.msrb.mxu1 %v3139_v25  ;;  %v502_v55 = vand.u32 2147483648, %v490_v37  ;;  %v500_v40 = vand.u32 2147483647, %v490_v37  ;;  %vm496_vm0 = vweird.f32 %v490_v37  ;;  %v3142_v25 = vld [vmem:[#allocation38_spill] sm:$0xff] }
 0x1ee   :  { %1850 = vrcp.f32 %v510_v41  ;;  %v522_v38 = vand.u32 2147483648, %v510_v41  ;;  %vm516_vm5 = vweird.f32 %v510_v41 }
 0x1ef   :  { %846 = vmatpush.msrb.mxu1 %v3140_v18  ;;  %v503_v12 = vor.u32 1.1754944e-38, %v502_v55  ;;  %vm501_vm3 = vcmp.eq.f32.partialorder %v500_v40, 8.507059e+37  ;;  %v3143_v18 = vld [vmem:[#allocation40_spill] sm:$0xff] }
 0x1f0   :  { %v523_v55 = vor.u32 1.1754944e-38, %v522_v38 }
 0x1f1   :  { %847 = vmatpush.msrb.mxu1 %v3141_v59 }
 0x1f3   :  { %v1849_v30 = vpop.eup %1848  ;;  %848 = vmatpush.msrb.mxu1 %v3142_v25 }
 0x1f4   :  { %v1851_v27 = vpop.eup %1850  ;;  %v492_v1 = vmul.f32 %v1849_v30, %v490_v37  ;;  %vm497_vm15 = vweird.f32 %v1849_v30 }
 0x1f5   :  { %v512_v5 = vmul.f32 %v1851_v27, %v510_v41  ;;  %vm498_vm1 = vmor %vm496_vm0, %vm497_vm15  ;;  %vm517_vm4 = vweird.f32 %v1851_v27  ;;  %849 = vmatpush.msrb.mxu1 %v3143_v18 }
 0x1f6   :  { %v493_v10 = vsub.f32 1.0, %v492_v1  ;;  %vm518_vm6 = vmor %vm516_vm5, %vm517_vm4 }
 0x1f7   :  { %v513_v7 = vsub.f32 1.0, %v512_v5 }
 0x1f8   :  { %v494_v39 = vmul.f32 %v1849_v30, %v493_v10 }
 0x1f9   :  { %v514_v33 = vmul.f32 %v1851_v27, %v513_v7 }
 0x1fa   :  { %v495_v14 = vadd.f32 %v1849_v30, %v494_v39  ;;  %v520_v39 = vand.u32 2147483647, %v510_v41 }
 0x1fb   :  { %v515_v10 = vadd.f32 %v1851_v27, %v514_v33 }
 0x1fc   :  { %v499_v1 = vsel %vm498_vm1, %v1849_v30, %v495_v14  ;;  %vm521_vm7 = vcmp.eq.f32.partialorder %v520_v39, 8.507059e+37 }
 0x1fd   :  { %v504_v5 = vsel %vm501_vm3, %v503_v12, %v499_v1  ;;  %v519_v7 = vsel %vm518_vm6, %v1851_v27, %v515_v10  ;;  %v3144_v27 = vld [vmem:[#allocation31_spill] sm:$0xff]  ;;  %v3145_v1 = vld [vmem:[#allocation33_spill] sm:$0xff] }
 0x1fe   :  { %v526_v8 = vmul.f32 %v504_v5, %v484_v23  ;;  %v524_v14 = vsel %vm521_vm7, %v523_v55, %v519_v7  ;;  %v3152_v55 = vld [vmem:[#allocation26_spill] sm:$0xff] }
 0x1ff   :  { %v529_v16 = vsub.f32 1.0, %v524_v14  ;;  %v531_v12 = vmul.f32 %v524_v14, %v2474_v48 }
 0x200   :  { %v527_v37 = vadd.f32 %v526_v8, %v2535_v2 }
 0x202   :  { %1852 = vtanh.f32 %v527_v37  ;;  %v3149_v37 = vld [vmem:[#allocation23_spill] sm:$0xff] }
 0x208   :  { %v1853_v30 = vpop.eup %1852 }
 0x209   :  { %v530_v40 = vmul.f32 %v1853_v30, %v529_v16  ;;  %v3153_v16 = vld [vmem:[#allocation27_spill] sm:$0xff] }
 0x20b   :  { %v2565_v33 = vadd.f32 %v531_v12, %v530_v40  ;;  %v3154_v40 = vld [vmem:[#allocation28_spill] sm:$0xff] }
 0x20d   :  { %v534_v23 = vrot.slane %v2565_v33, 1  ;;  %536 = vst [vmem:[#allocation10 + $0x1] sm:$0x1] %v2565_v33  ;;  %636 = vmatmul.f32.vlgmr.msra.gmra.mxu1 %v2565_v33  ;;  %656 = vmatmul.f32.vlgmr.msra.gmra.mxu2 %v2565_v33 }
 0x20e   :  { %676 = vmatmul.f32.vlgmr.msra.gmra.mxu3 %v2565_v33  ;;  %1048 = vmatpush.msra.mxu1 %v2316_v43 }
 0x20f   :  { %537 = vst [vmem:[#allocation10 + $0x9] sm:$0x1] %v534_v23  ;;  %962 = vmatpush.msra.mxu3 %v3128_v0  ;;  %1156 = vmatpush.msra.mxu2 %v3128_v0 }
 0x210   :  { %1049 = vmatpush.msra.mxu1 %v2318_v44 }
 0x211   :  { %963 = vmatpush.msra.mxu3 %v2198_v4  ;;  %1157 = vmatpush.msra.mxu2 %v2198_v4 }
 0x212   :  { %1050 = vmatpush.msra.mxu1 %v2323_v47 }
 0x214   :  { %1051 = vmatpush.msra.mxu1 %v2326_v49 }
 0x216   :  { %1052 = vmatpush.msra.mxu1 %v2331_v52 }
 0x218   :  { %1053 = vmatpush.msra.mxu1 %v2334_v53 }
 0x21a   :  { %1054 = vmatpush.msra.mxu1 %v2340_v56 }
 0x21b   :  { %v597_v5 = vpop.f32.mrf.mxu1 }
 0x21c   :  { %1055 = vmatpush.msra.mxu1 %v2343_v58 }
 0x21e   :  { %1056 = vmatpush.msra.mxu1 %v2348_v60 }
 0x220   :  { %1057 = vmatpush.msra.mxu1 %v2351_v61 }
 0x222   :  { %1058 = vmatpush.msra.mxu1 %v2354_v62 }
 0x224   :  { %1059 = vmatpush.msra.mxu1 %v2358_v63 }
 0x226   :  { %1060 = vmatpush.msra.mxu1 %v2362_v19 }
 0x228   :  { %1061 = vmatpush.msra.mxu1 %v2366_v42 }
 0x22a   :  { %1062 = vmatpush.msra.mxu1 %v2371_v46 }
 0x22c   :  { %1063 = vmatpush.msra.mxu1 %v3126_v3 }
 0x254   :  { %v738_v4 = vpop.permute.xlu1 %737 }
 0x255   :  { %v734_v8 = vpop.permute.xlu0 %733  ;;  %v739_v48 = vperm.slane %v738_v4, 0  ;;  %v3155_v4 = vld [vmem:[#allocation29_spill] sm:$0xff] }
 0x256   :  { %v735_v0 = vperm.slane %v734_v8, 0 }
 0x257   :  { %vm741_vm8 = vcmp.eq.s32.totalorder %v739_v48, %v2337_v54 }
 0x258   :  { %vm740_vm9 = vcmp.eq.s32.totalorder %v735_v0, %v2320_v45  ;;  %v1765_v2 = vsel %vm741_vm8, 1.0, %v3127_v21 }
 0x259   :  { %v1764_v38 = vsel %vm740_vm9, 1.0, %v3127_v21  ;;  %750 = vst [vmem:[#allocation1 + $0x1] ss:$9 sm:$0xff] %v1765_v2 }
 0x25a   :  { %748 = vst [vmem:[#allocation1] ss:$9 sm:$0xff] %v1764_v38  ;;  %v3156_v38 = vld [vmem:[#allocation30_spill] sm:$0xff] }
 0x261   :  { %v751_v41 = vld [vmem:[#allocation1] sm:$0xff] }
 0x262   :  { %1767 = vmatmul.msk.f32.vlgmr.msrb.gmra.mxu0 %vm162_vm2, %v751_v41  ;;  %1766 = vmatmul.msk.f32.vlgmr.msrb.gmra.mxu3 %vm162_vm2, %v751_v41 }
 0x263   :  { %814 = vmatpush.msrb.mxu0 %v2203_v6  ;;  %982 = vmatpush.msrb.mxu3 %v3144_v27  ;;  %v2608_v6 = vpop.f32.mrf.mxu1 }
 0x265   :  { %815 = vmatpush.msrb.mxu0 %v2213_v9  ;;  %983 = vmatpush.msrb.mxu3 %v3145_v1 }
 0x267   :  { %816 = vmatpush.msrb.mxu0 %v2222_v11 }
 0x269   :  { %817 = vmatpush.msrb.mxu0 %v2228_v13  ;;  %v577_v13 = vpop.f32.mrf.mxu3 }
 0x26a   :  { %1768 = vmatmul.msk.f32.vlgmr.msra.gmra.mxu0 %vm162_vm2, %v751_v41 }
 0x26b   :  { %818 = vmatpush.msrb.mxu0 %v2234_v15 }
 0x26d   :  { %819 = vmatpush.msrb.mxu0 %v2238_v17 }
 0x26f   :  { %820 = vmatpush.msrb.mxu0 %v2246_v20 }
 0x271   :  { %821 = vmatpush.msrb.mxu0 %v2253_v22 }
 0x273   :  { %822 = vmatpush.msrb.mxu0 %v2259_v24  ;;  %v2137_v24 = vmov 4  }
 0x274   :  { %1826 = vset.pattern.permute.xlu1 %v2137_v24  ;;  %1825 = vset.pattern.permute.xlu2 %v2137_v24 }
 0x275   :  { %823 = vmatpush.msrb.mxu0 %v2265_v26  ;;  %931 = vperm.xlu1 %1826, %v3135_v57   ;;  %v3151_v57 = vld [vmem:[#allocation25_spill] sm:$0xff] }
 0x277   :  { %824 = vmatpush.msrb.mxu0 %v2273_v29  ;;  %v2622_v29 = vld [vmem:[#allocation2] sm:$0x1] }
 0x278   :  { %3146 = vst [vmem:[#allocation41_spill] sm:$0xff] %v2622_v29  ;;  %927 = vperm.xlu2 %1825, %v2622_v29  }
 0x279   :  { %825 = vmatpush.msrb.mxu0 %v2283_v32  ;;  %v3147_v32 = vld [vmem:[#allocation20_spill] sm:$0xff] }
 0x27b   :  { %826 = vmatpush.msrb.mxu0 %v2291_v34 }
 0x27d   :  { %827 = vmatpush.msrb.mxu0 %v2295_v36  ;;  %v3148_v36 = vld [vmem:[#allocation21_spill] sm:$0xff] }
 0x27f   :  { %828 = vmatpush.msrb.mxu0 %v3129_v50  ;;  %v3150_v50 = vld [vmem:[#allocation24_spill] sm:$0xff] }
 0x281   :  { %829 = vmatpush.msrb.mxu0 %v3130_v35 }
 0x283   :  { %1028 = vmatpush.msra.mxu0 %v3147_v32  ;;  %v3159_v32 = vld [vmem:[#allocation35_spill] sm:$0xff] }
 0x285   :  { %1029 = vmatpush.msra.mxu0 %v3148_v36 }
 0x287   :  { %1030 = vmatpush.msra.mxu0 %v3149_v37 }
 0x289   :  { %1031 = vmatpush.msra.mxu0 %v3150_v50 }
 0x28a   :  { %v637_v9 = vpop.f32.mrf.mxu1 }
 0x28b   :  { %v638_v11 = vadd.f32 %v637_v9, %v2451_v31  ;;  %1032 = vmatpush.msra.mxu0 %v3151_v57 }
 0x28d   :  { %v680_v15 = vadd.f32 %v638_v11, %v577_v13  ;;  %1033 = vmatpush.msra.mxu0 %v3152_v55 }
 0x28f   :  { %v1762_v17 = vmul.f32 -1.442695, %v680_v15  ;;  %1034 = vmatpush.msra.mxu0 %v3153_v16  ;;  %v2713_v16 = vld [vmem:[#allocation7 + $0xc0] sm:$0xff] }
 0x290   :  { %v657_v20 = vpop.f32.mrf.mxu2 }
 0x291   :  { %1854 = vpow2.f32 %v1762_v17  ;;  %v658_v22 = vadd.f32 %v657_v20, %v2442_v51  ;;  %1035 = vmatpush.msra.mxu0 %v3154_v40  ;;  %v677_v2 = vpop.f32.mrf.mxu3  ;;  %v3158_v17 = vld [vmem:[#allocation34_spill] sm:$0xff] }
 0x292   :  { %v678_v11 = vadd.f32 %v677_v2, %v2469_v28  ;;  %v2719_v40 = vld [vmem:[#allocation7 + $0x90] sm:$0xff] }
 0x293   :  { %v700_v26 = vadd.f32 %v658_v22, %v597_v5  ;;  %1036 = vmatpush.msra.mxu0 %v3155_v4  ;;  %v3157_v5 = vld [vmem:[#allocation32_spill] sm:$0xff]  ;;  %3161 = vst [vmem:[#allocation37_spill] sm:$0xff] %v2719_v40 }
 0x294   :  { %v2727_v4 = vld [vmem:[#allocation7 + $0x60] sm:$0xff] }
 0x295   :  { %v1763_v34 = vmul.f32 -1.442695, %v700_v26  ;;  %1037 = vmatpush.msra.mxu0 %v3156_v38  ;;  %3162 = vst [vmem:[#allocation39_spill] sm:$0xff] %v2727_v4 }
 0x297   :  { %v1855_v10 = vpop.eup %1854  ;;  %1856 = vpow2.f32 %v1763_v34  ;;  %1038 = vmatpush.msra.mxu0 %v3157_v5 }
 0x298   :  { %v684_v39 = vadd.f32 1.0, %v1855_v10 }
 0x299   :  { %1039 = vmatpush.msra.mxu0 %v3158_v17 }
 0x29a   :  { %1858 = vrcp.f32 %v684_v39  ;;  %v696_v23 = vand.u32 2147483648, %v684_v39  ;;  %v694_v48 = vand.u32 2147483647, %v684_v39  ;;  %vm690_vm11 = vweird.f32 %v684_v39 }
 0x29b   :  { %1040 = vmatpush.msra.mxu0 %v3159_v32  ;;  %v2759_v32 = vld [vmem:[#allocation7 + $0xf8] sm:$0xff] }
 0x29c   :  { %v697_v1 = vor.u32 1.1754944e-38, %v696_v23  ;;  %vm695_vm13 = vcmp.eq.f32.partialorder %v694_v48, 8.507059e+37  ;;  %v2733_v48 = vld [vmem:[#allocation7 + $0x30] sm:$0xff]  ;;  %3163 = vst [vmem:[#allocation22_spill] sm:$0xff] %v2759_v32 }
 0x29d   :  { %v1857_v35 = vpop.eup %1856  ;;  %1041 = vmatpush.msra.mxu0 %v3141_v59  ;;  %v2655_v59 = vld [vmem:[#allocation5 + $0x18] sm:$0xff] }
 0x29e   :  { %v704_v7 = vadd.f32 1.0, %v1857_v35 }
 0x29f   :  { %1042 = vmatpush.msra.mxu0 %v3142_v25  ;;  %v2659_v25 = vld [vmem:[#allocation5 + $0x8] sm:$0xff] }
 0x2a0   :  { %v1859_v14 = vpop.eup %1858  ;;  %1860 = vrcp.f32 %v704_v7  ;;  %v716_v22 = vand.u32 2147483648, %v704_v7  ;;  %v714_v26 = vand.u32 2147483647, %v704_v7  ;;  %vm710_vm15 = vweird.f32 %v704_v7 }
 0x2a1   :  { %v686_v30 = vmul.f32 %v1859_v14, %v684_v39  ;;  %vm691_vm10 = vweird.f32 %v1859_v14  ;;  %1043 = vmatpush.msra.mxu0 %v3143_v18  ;;  %v2652_v18 = vld [vmem:[#allocation5 + $0x20] sm:$0xff] }
 0x2a2   :  { %vm692_vm12 = vmor %vm690_vm11, %vm691_vm10  ;;  %v717_v10 = vor.u32 1.1754944e-38, %v716_v22  ;;  %vm715_vm1 = vcmp.eq.f32.partialorder %v714_v26, 8.507059e+37  ;;  %v2750_v22 = vld [vmem:[#allocation7 + $0x140] sm:$0xff]  ;;  %v2756_v26 = vld [vmem:[#allocation7 + $0x110] sm:$0xff] }
 0x2a3   :  { %v687_v12 = vsub.f32 1.0, %v686_v30  ;;  %v2716_v30 = vld [vmem:[#allocation7 + $0xa8] sm:$0xff] }
 0x2a4   :  { %3160 = vst [vmem:[#allocation19_spill] sm:$0xff] %v2716_v30 }
 0x2a5   :  { %v688_v8 = vmul.f32 %v1859_v14, %v687_v12  ;;  %v2722_v12 = vld [vmem:[#allocation7 + $0x78] sm:$0xff] }
 0x2a6   :  { %v1861_v0 = vpop.eup %1860 }
 0x2a7   :  { %v706_v41 = vmul.f32 %v1861_v0, %v704_v7  ;;  %v689_v27 = vadd.f32 %v1859_v14, %v688_v8  ;;  %vm711_vm14 = vweird.f32 %v1861_v0  ;;  %v2730_v8 = vld [vmem:[#allocation7 + $0x48] sm:$0xff] }
 0x2a8   :  { %vm712_vm0 = vmor %vm710_vm15, %vm711_vm14 }
 0x2a9   :  { %v707_v9 = vsub.f32 1.0, %v706_v41  ;;  %v693_v13 = vsel %vm692_vm12, %v1859_v14, %v689_v27  ;;  %v2710_v14 = vld [vmem:[#allocation7 + $0xd8] sm:$0xff] }
 0x2aa   :  { %v698_v15 = vsel %vm695_vm13, %v697_v1, %v693_v13  ;;  %v2741_v1 = vld [vmem:[#allocation7] sm:$0xff] }
 0x2ab   :  { %v708_v20 = vmul.f32 %v1861_v0, %v707_v9  ;;  %v720_v24 = vmul.f32 %v698_v15, %v678_v11  ;;  %v2744_v9 = vld [vmem:[#allocation7 + $0x170] sm:$0xff]  ;;  %v2747_v15 = vld [vmem:[#allocation7 + $0x158] sm:$0xff] }
 0x2ad   :  { %v709_v34 = vadd.f32 %v1861_v0, %v708_v20  ;;  %v721_v36 = vadd.f32 %v720_v24, %v2608_v6  ;;  %v2753_v24 = vld [vmem:[#allocation7 + $0x128] sm:$0xff] }
 0x2af   :  { %v713_v39 = vsel %vm712_vm0, %v1861_v0, %v709_v34  ;;  %1862 = vtanh.f32 %v721_v36  ;;  %v2736_v0 = vld [vmem:[#allocation7 + $0x18] sm:$0xff]  ;;  %v2138_v36 = vmov 5  }
 0x2b0   :  { %v718_v37 = vsel %vm715_vm1, %v717_v10, %v713_v39  ;;  %1828 = vset.pattern.permute.xlu0 %v2138_v36  ;;  %1827 = vset.pattern.permute.xlu2 %v2138_v36 }
 0x2b1   :  { %v723_v50 = vsub.f32 1.0, %v718_v37  ;;  %v725_v7 = vmul.f32 %v718_v37, %v2565_v33  ;;  %v2662_v33 = vld [vmem:[#allocation5] sm:$0xff]  ;;  %v2762_v37 = vld [vmem:[#allocation2 + $0x1] sm:$0x1]  ;;  %1121 = vperm.xlu2 %1827, %v2622_v29  }
 0x2b2   :  { %3164 = vst [vmem:[#allocation18_spill] sm:$0xff] %v2762_v37  ;;  %1125 = vperm.xlu0 %1828, %v2762_v37  }
 0x2b5   :  { %v1863_v57 = vpop.eup %1862 }
 0x2b6   :  { %v724_v35 = vmul.f32 %v1863_v57, %v723_v50  ;;  %v2766_v57 = vld [vmem:[#allocation7 + $0xe0] sm:$0xff] }
 0x2b7   :  { %3165 = vst [vmem:[#allocation36_spill] sm:$0xff] %v2766_v57 }
 0x2b8   :  { %v2644_v55 = vadd.f32 %v725_v7, %v724_v35  ;;  %v2769_v35 = vld [vmem:[#allocation7 + $0xc8] sm:$0xff]  ;;  %v2772_v7 = vld [vmem:[#allocation7 + $0xb0] sm:$0xff] }
 0x2b9   :  { %3166 = vst [vmem:[#allocation38_spill] sm:$0xff] %v2769_v35 }
 0x2ba   :  { %v728_v6 = vrot.slane %v2644_v55, 1  ;;  %730 = vst [vmem:[#allocation10 + $0x2] sm:$0x1] %v2644_v55  ;;  %830 = vmatmul.f32.vlgmr.msrb.gmra.mxu0 %v2644_v55  ;;  %850 = vmatmul.f32.vlgmr.msrb.gmra.mxu1 %v2644_v55 }
 0x2bb   :  { %870 = vmatmul.f32.vlgmr.msrb.gmra.mxu2 %v2644_v55  ;;  %1242 = vmatpush.msrb.mxu0 %v2316_v43  ;;  %3167 = vst [vmem:[#allocation40_spill] sm:$0xff] %v2772_v7 }
 0x2bc   :  { %731 = vst [vmem:[#allocation10 + $0xa] sm:$0x1] %v728_v6  ;;  %1176 = vmatpush.msrb.mxu2 %v2652_v18  ;;  %1350 = vmatpush.msrb.mxu1 %v2655_v59  ;;  %v2775_v6 = vld [vmem:[#allocation7 + $0x98] sm:$0xff] }
 0x2bd   :  { %1243 = vmatpush.msrb.mxu0 %v2318_v44  ;;  %3168 = vst [vmem:[#allocation31_spill] sm:$0xff] %v2775_v6 }
 0x2be   :  { %1177 = vmatpush.msrb.mxu2 %v2659_v25  ;;  %1351 = vmatpush.msrb.mxu1 %v2662_v33 }
 0x2bf   :  { %1244 = vmatpush.msrb.mxu0 %v2323_v47 }
 0x2c1   :  { %1245 = vmatpush.msrb.mxu0 %v2326_v49 }
 0x2c3   :  { %1246 = vmatpush.msrb.mxu0 %v2331_v52 }
 0x2c5   :  { %1247 = vmatpush.msrb.mxu0 %v2334_v53 }
 0x2c7   :  { %1248 = vmatpush.msrb.mxu0 %v2340_v56 }
 0x2c9   :  { %1249 = vmatpush.msrb.mxu0 %v2343_v58  ;;  %v2684_v58 = vld [vmem:[#allocation5 + $0x28] sm:$0xff] }
 0x2cb   :  { %1250 = vmatpush.msrb.mxu0 %v2348_v60  ;;  %v2687_v60 = vld [vmem:[#allocation5 + $0x10] sm:$0xff] }
 0x2cd   :  { %1251 = vmatpush.msrb.mxu0 %v2351_v61  ;;  %v2691_v61 = vld [vmem:[#allocation7 + $0x168] sm:$0xff] }
 0x2cf   :  { %1252 = vmatpush.msrb.mxu0 %v2354_v62  ;;  %v2694_v62 = vld [vmem:[#allocation7 + $0x150] sm:$0xff] }
 0x2d1   :  { %1253 = vmatpush.msrb.mxu0 %v2358_v63  ;;  %v2697_v63 = vld [vmem:[#allocation7 + $0x138] sm:$0xff] }
 0x2d2   :  { %v928_v43 = vpop.permute.xlu2 %927 }
 0x2d3   :  { %1254 = vmatpush.msrb.mxu0 %v2362_v19  ;;  %v929_v44 = vperm.slane %v928_v43, 0  ;;  %v2700_v19 = vld [vmem:[#allocation7 + $0x120] sm:$0xff] }
 0x2d5   :  { %1255 = vmatpush.msrb.mxu0 %v2366_v42  ;;  %vm934_vm3 = vcmp.eq.s32.totalorder %v929_v44, %v2320_v45  ;;  %v2704_v42 = vld [vmem:[#allocation7 + $0x108] sm:$0xff] }
 0x2d6   :  { %v1771_v47 = vsel %vm934_vm3, 1.0, %v3127_v21 }
 0x2d7   :  { %1256 = vmatpush.msrb.mxu0 %v2371_v46  ;;  %942 = vst [vmem:[#allocation1] ss:$9 sm:$0xff] %v1771_v47  ;;  %v2707_v46 = vld [vmem:[#allocation7 + $0xf0] sm:$0xff] }
 0x2d9   :  { %1257 = vmatpush.msrb.mxu0 %v3126_v3 }
 0x2df   :  { %v791_v3 = vpop.f32.mrf.mxu0 }
 0x2e5   :  { %v771_v5 = vpop.f32.mrf.mxu3 }
 0x2e7   :  { %v932_v49 = vpop.permute.xlu1 %931  ;;  %v2725_v23 = vpop.f32.mrf.mxu0 }
 0x2e8   :  { %v933_v52 = vperm.slane %v932_v49, 0  ;;  %v2778_v49 = vld [vmem:[#allocation7 + $0x80] sm:$0xff] }
 0x2e9   :  { %3169 = vst [vmem:[#allocation33_spill] sm:$0xff] %v2778_v49 }
 0x2ea   :  { %vm935_vm4 = vcmp.eq.s32.totalorder %v933_v52, %v2337_v54 }
 0x2eb   :  { %v1772_v53 = vsel %vm935_vm4, 1.0, %v3127_v21 }
 0x2ec   :  { %944 = vst [vmem:[#allocation1 + $0x1] ss:$9 sm:$0xff] %v1772_v53 }
 0x2f3   :  { %v945_v56 = vld [vmem:[#allocation1] sm:$0xff] }
 0x2f4   :  { %1773 = vmatmul.msk.f32.vlgmr.msra.gmra.mxu3 %vm162_vm2, %v945_v56 }
 0x2f5   :  { %1002 = vmatpush.msra.mxu3 %v2684_v58 }
 0x2f7   :  { %1003 = vmatpush.msra.mxu3 %v2687_v60 }
 0x2fc   :  { %1774 = vmatmul.msk.f32.vlgmr.msrb.gmra.mxu3 %vm162_vm2, %v945_v56 }
 0x2fd   :  { %1008 = vmatpush.msrb.mxu3 %v2691_v61 }
 0x2ff   :  { %1009 = vmatpush.msrb.mxu3 %v2694_v62 }
 0x301   :  { %1010 = vmatpush.msrb.mxu3 %v2697_v63 }
 0x303   :  { %1011 = vmatpush.msrb.mxu3 %v2700_v19 }
 0x304   :  { %1775 = vmatmul.msk.f32.vlgmr.msra.gmra.mxu3 %vm162_vm2, %v945_v56  ;;  %v2781_v56 = vld [vmem:[#allocation7 + $0x68] sm:$0xff] }
 0x305   :  { %1012 = vmatpush.msrb.mxu3 %v2704_v42  ;;  %3170 = vst [vmem:[#allocation20_spill] sm:$0xff] %v2781_v56 }
 0x307   :  { %1013 = vmatpush.msrb.mxu3 %v2707_v46 }
 0x309   :  { %1014 = vmatpush.msrb.mxu3 %v2710_v14 }
 0x30b   :  { %1015 = vmatpush.msrb.mxu3 %v2713_v16 }
 0x30d   :  { %1016 = vmatpush.msrb.mxu3 %v2716_v30 }
 0x30f   :  { %1017 = vmatpush.msrb.mxu3 %v2719_v40 }
 0x311   :  { %1018 = vmatpush.msrb.mxu3 %v2722_v12 }
 0x313   :  { %1019 = vmatpush.msrb.mxu3 %v2727_v4 }
 0x315   :  { %1020 = vmatpush.msrb.mxu3 %v2730_v8 }
 0x317   :  { %1021 = vmatpush.msrb.mxu3 %v2733_v48 }
 0x319   :  { %1022 = vmatpush.msrb.mxu3 %v2736_v0 }
 0x31b   :  { %1023 = vmatpush.msrb.mxu3 %v2741_v1 }
 0x31d   :  { %1222 = vmatpush.msra.mxu3 %v2744_v9 }
 0x31f   :  { %1223 = vmatpush.msra.mxu3 %v2747_v15 }
 0x321   :  { %1224 = vmatpush.msra.mxu3 %v2750_v22 }
 0x323   :  { %1225 = vmatpush.msra.mxu3 %v2753_v24 }
 0x325   :  { %1226 = vmatpush.msra.mxu3 %v2756_v26 }
 0x327   :  { %1227 = vmatpush.msra.mxu3 %v2759_v32 }
 0x329   :  { %1228 = vmatpush.msra.mxu3 %v2766_v57 }
 0x32b   :  { %1229 = vmatpush.msra.mxu3 %v2769_v35 }
 0x32d   :  { %1230 = vmatpush.msra.mxu3 %v2772_v7 }
 0x32f   :  { %1231 = vmatpush.msra.mxu3 %v2775_v6 }
 0x331   :  { %1232 = vmatpush.msra.mxu3 %v2778_v49 }
 0x333   :  { %1233 = vmatpush.msra.mxu3 %v2781_v56 }
 0x337   :  { %v831_v2 = vpop.f32.mrf.mxu0  ;;  %v851_v38 = vpop.f32.mrf.mxu1 }
 0x338   :  { %v832_v41 = vadd.f32 %v831_v2, %v2451_v31  ;;  %v852_v27 = vadd.f32 %v851_v38, %v2442_v51 }
 0x33a   :  { %v874_v11 = vadd.f32 %v832_v41, %v771_v5  ;;  %v894_v13 = vadd.f32 %v852_v27, %v791_v3  ;;  %v2784_v27 = vld [vmem:[#allocation7 + $0x50] sm:$0xff] }
 0x33b   :  { %1234 = vmatpush.msra.mxu3 %v2784_v27 }
 0x33c   :  { %v1769_v17 = vmul.f32 -1.442695, %v874_v11  ;;  %v1770_v20 = vmul.f32 -1.442695, %v894_v13 }
 0x33e   :  { %1864 = vpow2.f32 %v1769_v17  ;;  %v871_v11 = vpop.f32.mrf.mxu2  ;;  %v2787_v17 = vld [vmem:[#allocation7 + $0x38] sm:$0xff] }
 0x33f   :  { %1866 = vpow2.f32 %v1770_v20  ;;  %1235 = vmatpush.msra.mxu3 %v2787_v17 }
 0x344   :  { %v1865_v34 = vpop.eup %1864 }
 0x345   :  { %v1867_v10 = vpop.eup %1866  ;;  %v878_v39 = vadd.f32 1.0, %v1865_v34  ;;  %v872_v34 = vadd.f32 %v871_v11, %v2469_v28 }
 0x346   :  { %v898_v50 = vadd.f32 1.0, %v1867_v10  ;;  %v2791_v10 = vld [vmem:[#allocation7 + $0x20] sm:$0xff] }
 0x347   :  { %1868 = vrcp.f32 %v878_v39  ;;  %v890_v2 = vand.u32 2147483648, %v878_v39  ;;  %v888_v41 = vand.u32 2147483647, %v878_v39  ;;  %vm884_vm6 = vweird.f32 %v878_v39  ;;  %3171 = vst [vmem:[#allocation21_spill] sm:$0xff] %v2791_v10  ;;  %1236 = vmatpush.msra.mxu3 %v2791_v10 }
 0x348   :  { %1870 = vrcp.f32 %v898_v50  ;;  %vm904_vm10 = vweird.f32 %v898_v50 }
 0x349   :  { %v891_v20 = vor.u32 1.1754944e-38, %v890_v2  ;;  %vm889_vm8 = vcmp.eq.f32.partialorder %v888_v41, 8.507059e+37 }
 0x34d   :  { %v1869_v43 = vpop.eup %1868 }
 0x34e   :  { %v1871_v44 = vpop.eup %1870  ;;  %v880_v47 = vmul.f32 %v1869_v43, %v878_v39  ;;  %vm885_vm5 = vweird.f32 %v1869_v43  ;;  %v2794_v39 = vld [vmem:[#allocation7 + $0x8] sm:$0xff] }
 0x34f   :  { %v900_v52 = vmul.f32 %v1871_v44, %v898_v50  ;;  %vm886_vm7 = vmor %vm884_vm6, %vm885_vm5  ;;  %vm905_vm9 = vweird.f32 %v1871_v44  ;;  %1237 = vmatpush.msra.mxu3 %v2794_v39 }
 0x350   :  { %v881_v53 = vsub.f32 1.0, %v880_v47  ;;  %vm906_vm11 = vmor %vm904_vm10, %vm905_vm9 }
 0x351   :  { %v901_v3 = vsub.f32 1.0, %v900_v52 }
 0x352   :  { %v882_v38 = vmul.f32 %v1869_v43, %v881_v53  ;;  %v910_v53 = vand.u32 2147483648, %v898_v50 }
 0x353   :  { %v902_v5 = vmul.f32 %v1871_v44, %v901_v3 }
 0x354   :  { %v883_v13 = vadd.f32 %v1869_v43, %v882_v38  ;;  %v908_v38 = vand.u32 2147483647, %v898_v50  ;;  %v911_v41 = vor.u32 1.1754944e-38, %v910_v53  ;;  %v2816_v50 = vld [vmem:[#allocation7 + $0x148] sm:$0xff]  ;;  %v2837_v53 = vld [vmem:[#allocation7 + $0xa0] sm:$0xff] }
 0x355   :  { %v903_v52 = vadd.f32 %v1871_v44, %v902_v5 }
 0x356   :  { %v887_v36 = vsel %vm886_vm7, %v1869_v43, %v883_v13  ;;  %vm909_vm12 = vcmp.eq.f32.partialorder %v908_v38, 8.507059e+37  ;;  %v2843_v38 = vld [vmem:[#allocation7 + $0x70] sm:$0xff] }
 0x357   :  { %v892_v47 = vsel %vm889_vm8, %v891_v20, %v887_v36  ;;  %v907_v43 = vsel %vm906_vm11, %v1871_v44, %v903_v52  ;;  %v2819_v44 = vld [vmem:[#allocation7 + $0x130] sm:$0xff]  ;;  %v2834_v52 = vld [vmem:[#allocation7 + $0xb8] sm:$0xff]  ;;  %3172 = vst [vmem:[#allocation23_spill] sm:$0xff] %v2843_v38 }
 0x358   :  { %v914_v3 = vmul.f32 %v892_v47, %v872_v34  ;;  %v912_v11 = vsel %vm909_vm12, %v911_v41, %v907_v43  ;;  %v2828_v47 = vld [vmem:[#allocation7 + $0xe8] sm:$0xff]  ;;  %v2849_v43 = vld [vmem:[#allocation7 + $0x40] sm:$0xff] }
 0x359   :  { %v917_v13 = vsub.f32 1.0, %v912_v11  ;;  %v919_v5 = vmul.f32 %v912_v11, %v2644_v55  ;;  %v2811_v55 = vld [vmem:[#allocation7 + $0x160] sm:$0xff]  ;;  %3174 = vst [vmem:[#allocation25_spill] sm:$0xff] %v2849_v43  ;;  %v2852_v41 = vld [vmem:[#allocation7 + $0x28] sm:$0xff]  ;;  %v2855_v11 = vld [vmem:[#allocation7 + $0x10] sm:$0xff] }
 0x35a   :  { %v915_v2 = vadd.f32 %v914_v3, %v2725_v23  ;;  %v2806_v23 = vld [vmem:[#allocation7 + $0x178] sm:$0xff]  ;;  %v2840_v3 = vld [vmem:[#allocation7 + $0x88] sm:$0xff] }
 0x35c   :  { %1872 = vtanh.f32 %v915_v2  ;;  %v2846_v2 = vld [vmem:[#allocation7 + $0x58] sm:$0xff] }
 0x35d   :  { %3173 = vst [vmem:[#allocation24_spill] sm:$0xff] %v2846_v2 }
 0x362   :  { %v1873_v10 = vpop.eup %1872 }
 0x363   :  { %v918_v20 = vmul.f32 %v1873_v10, %v917_v13  ;;  %v2822_v10 = vld [vmem:[#allocation7 + $0x118] sm:$0xff]  ;;  %v1122_v13 = vpop.permute.xlu2 %1121 }
 0x365   :  { %v2799_v34 = vadd.f32 %v919_v5, %v918_v20  ;;  %v1123_v20 = vperm.slane %v1122_v13, 0 }
 0x367   :  { %v922_v36 = vrot.slane %v2799_v34, 1  ;;  %924 = vst [vmem:[#allocation10 + $0x3] sm:$0x1] %v2799_v34  ;;  %1024 = vmatmul.f32.vlgmr.msrb.gmra.mxu3 %v2799_v34  ;;  %1044 = vmatmul.f32.vlgmr.msra.gmra.mxu0 %v2799_v34  ;;  %vm1128_vm13 = vcmp.eq.s32.totalorder %v1123_v20, %v2320_v45 }
 0x368   :  { %1064 = vmatmul.f32.vlgmr.msra.gmra.mxu1 %v2799_v34  ;;  %1436 = vmatpush.msrb.mxu3 %v2806_v23  ;;  %v1778_v5 = vsel %vm1128_vm13, 1.0, %v3127_v21 }
 0x369   :  { %925 = vst [vmem:[#allocation10 + $0xb] sm:$0x1] %v922_v36  ;;  %1370 = vmatpush.msra.mxu1 %v2652_v18  ;;  %1544 = vmatpush.msra.mxu0 %v2655_v59  ;;  %v2825_v59 = vld [vmem:[#allocation7 + $0x100] sm:$0xff]  ;;  %v1126_v36 = vpop.permute.xlu0 %1125 }
 0x36a   :  { %1437 = vmatpush.msrb.mxu3 %v2811_v55  ;;  %1136 = vst [vmem:[#allocation1] ss:$9 sm:$0xff] %v1778_v5 }
 0x36b   :  { %1371 = vmatpush.msra.mxu1 %v2659_v25  ;;  %1545 = vmatpush.msra.mxu0 %v2662_v33  ;;  %v2831_v33 = vld [vmem:[#allocation7 + $0xd0] sm:$0xff] }
 0x36c   :  { %1438 = vmatpush.msrb.mxu3 %v2816_v50 }
 0x36e   :  { %1439 = vmatpush.msrb.mxu3 %v2819_v44 }
 0x370   :  { %1440 = vmatpush.msrb.mxu3 %v2822_v10 }
 0x372   :  { %1441 = vmatpush.msrb.mxu3 %v2825_v59 }
 0x374   :  { %1442 = vmatpush.msrb.mxu3 %v2828_v47 }
 0x376   :  { %1443 = vmatpush.msrb.mxu3 %v2831_v33 }
 0x377   :  { %v965_v13 = vpop.f32.mrf.mxu3 }
 0x378   :  { %1444 = vmatpush.msrb.mxu3 %v2834_v52 }
 0x37a   :  { %1445 = vmatpush.msrb.mxu3 %v2837_v53 }
 0x37c   :  { %1446 = vmatpush.msrb.mxu3 %v2840_v3 }
 0x37e   :  { %1447 = vmatpush.msrb.mxu3 %v2843_v38 }
 0x380   :  { %1448 = vmatpush.msrb.mxu3 %v2846_v2  ;;  %v1127_v2 = vperm.slane %v1126_v36, 0 }
 0x382   :  { %1449 = vmatpush.msrb.mxu3 %v2849_v43  ;;  %vm1129_vm14 = vcmp.eq.s32.totalorder %v1127_v2, %v2337_v54  ;;  %v985_v2 = vpop.f32.mrf.mxu3 }
 0x383   :  { %v1779_v43 = vsel %vm1129_vm14, 1.0, %v3127_v21 }
 0x384   :  { %1450 = vmatpush.msrb.mxu3 %v2852_v41  ;;  %1138 = vst [vmem:[#allocation1 + $0x1] ss:$9 sm:$0xff] %v1779_v43 }
 0x386   :  { %1451 = vmatpush.msrb.mxu3 %v2855_v11 }
 0x38a   :  { %v2878_v43 = vpop.f32.mrf.mxu3 }
 0x38b   :  { %v1139_v38 = vld [vmem:[#allocation1] sm:$0xff] }
 0x38c   :  { %1780 = vmatmul.msk.f32.vlgmr.msra.gmra.mxu2 %vm162_vm2, %v1139_v38 }
 0x38d   :  { %1196 = vmatpush.msra.mxu2 %v2684_v58 }
 0x38f   :  { %1197 = vmatpush.msra.mxu2 %v2687_v60 }
 0x394   :  { %1781 = vmatmul.msk.f32.vlgmr.msrb.gmra.mxu2 %vm162_vm2, %v1139_v38 }
 0x395   :  { %1202 = vmatpush.msrb.mxu2 %v2691_v61 }
 0x397   :  { %1203 = vmatpush.msrb.mxu2 %v2694_v62 }
 0x399   :  { %1204 = vmatpush.msrb.mxu2 %v2697_v63 }
 0x39b   :  { %1205 = vmatpush.msrb.mxu2 %v2700_v19 }
 0x39c   :  { %1782 = vmatmul.msk.f32.vlgmr.msra.gmra.mxu2 %vm162_vm2, %v1139_v38 }
 0x39d   :  { %1206 = vmatpush.msrb.mxu2 %v2704_v42 }
 0x39f   :  { %1207 = vmatpush.msrb.mxu2 %v2707_v46 }
 0x3a1   :  { %1208 = vmatpush.msrb.mxu2 %v2710_v14 }
 0x3a3   :  { %1209 = vmatpush.msrb.mxu2 %v2713_v16 }
 0x3a5   :  { %1210 = vmatpush.msrb.mxu2 %v2716_v30 }
 0x3a7   :  { %1211 = vmatpush.msrb.mxu2 %v2719_v40 }
 0x3a9   :  { %1212 = vmatpush.msrb.mxu2 %v2722_v12 }
 0x3ab   :  { %1213 = vmatpush.msrb.mxu2 %v2727_v4 }
 0x3ad   :  { %1214 = vmatpush.msrb.mxu2 %v2730_v8 }
 0x3af   :  { %1215 = vmatpush.msrb.mxu2 %v2733_v48 }
 0x3b1   :  { %1216 = vmatpush.msrb.mxu2 %v2736_v0 }
 0x3b3   :  { %1217 = vmatpush.msrb.mxu2 %v2741_v1 }
 0x3b5   :  { %1416 = vmatpush.msra.mxu2 %v2744_v9 }
 0x3b7   :  { %1417 = vmatpush.msra.mxu2 %v2747_v15 }
 0x3b9   :  { %1418 = vmatpush.msra.mxu2 %v2750_v22 }
 0x3bb   :  { %1419 = vmatpush.msra.mxu2 %v2753_v24 }
 0x3bd   :  { %1420 = vmatpush.msra.mxu2 %v2756_v26 }
 0x3bf   :  { %1421 = vmatpush.msra.mxu2 %v2759_v32 }
 0x3c1   :  { %1422 = vmatpush.msra.mxu2 %v2766_v57 }
 0x3c3   :  { %1423 = vmatpush.msra.mxu2 %v2769_v35 }
 0x3c5   :  { %1424 = vmatpush.msra.mxu2 %v2772_v7 }
 0x3c7   :  { %1425 = vmatpush.msra.mxu2 %v2775_v6 }
 0x3c9   :  { %1426 = vmatpush.msra.mxu2 %v2778_v49 }
 0x3cb   :  { %1427 = vmatpush.msra.mxu2 %v2781_v56 }
 0x3cd   :  { %1428 = vmatpush.msra.mxu2 %v2784_v27 }
 0x3cf   :  { %1429 = vmatpush.msra.mxu2 %v2787_v17 }
 0x3e4   :  { %v1045_v38 = vpop.f32.mrf.mxu0 }
 0x3e5   :  { %v1046_v20 = vadd.f32 %v1045_v38, %v2442_v51  ;;  %v2139_v51 = vmov 6  }
 0x3e6   :  { %1829 = vset.pattern.permute.xlu1 %v2139_v51  ;;  %1830 = vset.pattern.permute.xlu2 %v2139_v51 }
 0x3e7   :  { %v1088_v5 = vadd.f32 %v1046_v20, %v985_v2  ;;  %1315 = vperm.xlu1 %1829, %v2622_v29   ;;  %1319 = vperm.xlu2 %1830, %v2762_v37   ;;  %v1065_v29 = vpop.f32.mrf.mxu1 }
 0x3e9   :  { %v1777_v36 = vmul.f32 -1.442695, %v1088_v5 }
 0x3ea   :  { %v1025_v30 = vpop.f32.mrf.mxu3 }
 0x3eb   :  { %1874 = vpow2.f32 %v1777_v36  ;;  %v1026_v40 = vadd.f32 %v1025_v30, %v2451_v31 }
 0x3ed   :  { %v1068_v4 = vadd.f32 %v1026_v40, %v965_v13 }
 0x3ef   :  { %v1776_v38 = vmul.f32 -1.442695, %v1068_v4 }
 0x3f1   :  { %v1875_v2 = vpop.eup %1874  ;;  %1876 = vpow2.f32 %v1776_v38 }
 0x3f2   :  { %v1092_v20 = vadd.f32 1.0, %v1875_v2 }
 0x3f4   :  { %1878 = vrcp.f32 %v1092_v20  ;;  %v1104_v6 = vand.u32 2147483648, %v1092_v20  ;;  %vm1098_vm5 = vweird.f32 %v1092_v20  ;;  %v1102_v32 = vand.u32 2147483647, %v1092_v20 }
 0x3f6   :  { %vm1103_vm7 = vcmp.eq.f32.partialorder %v1102_v32, 8.507059e+37  ;;  %v3178_v32 = vld [vmem:[#allocation25_spill] sm:$0xff] }
 0x3f7   :  { %v1877_v30 = vpop.eup %1876 }
 0x3f8   :  { %v1072_v40 = vadd.f32 1.0, %v1877_v30 }
 0x3fa   :  { %1880 = vrcp.f32 %v1072_v40  ;;  %v1879_v51 = vpop.eup %1878  ;;  %v1084_v2 = vand.u32 2147483648, %v1072_v40  ;;  %v1082_v57 = vand.u32 2147483647, %v1072_v40  ;;  %vm1078_vm0 = vweird.f32 %v1072_v40 }
 0x3fb   :  { %v1094_v4 = vmul.f32 %v1879_v51, %v1092_v20  ;;  %vm1099_vm4 = vweird.f32 %v1879_v51  ;;  %v3182_v20 = vld [vmem:[#allocation42_spill] sm:$0xff] }
 0x3fc   :  { %v1085_v7 = vor.u32 1.1754944e-38, %v1084_v2  ;;  %vm1083_vm3 = vcmp.eq.f32.partialorder %v1082_v57, 8.507059e+37  ;;  %vm1100_vm6 = vmor %vm1098_vm5, %vm1099_vm4 }
 0x3fd   :  { %v1095_v36 = vsub.f32 1.0, %v1094_v4  ;;  %v1066_v4 = vadd.f32 %v1065_v29, %v2469_v28 }
 0x3ff   :  { %v1096_v37 = vmul.f32 %v1879_v51, %v1095_v36 }
 0x400   :  { %v1881_v13 = vpop.eup %1880 }
 0x401   :  { %v1074_v5 = vmul.f32 %v1881_v13, %v1072_v40  ;;  %vm1079_vm15 = vweird.f32 %v1881_v13 }
 0x402   :  { %vm1080_vm1 = vmor %vm1078_vm0, %vm1079_vm15 }
 0x403   :  { %v1075_v38 = vsub.f32 1.0, %v1074_v5  ;;  %v1097_v5 = vadd.f32 %v1879_v51, %v1096_v37 }
 0x405   :  { %v1076_v30 = vmul.f32 %v1881_v13, %v1075_v38  ;;  %v3175_v38 = vld [vmem:[#allocation21_spill] sm:$0xff]  ;;  %v1101_v2 = vsel %vm1100_vm6, %v1879_v51, %v1097_v5 }
 0x406   :  { %1430 = vmatpush.msra.mxu2 %v3175_v38 }
 0x407   :  { %v1077_v35 = vadd.f32 %v1881_v13, %v1076_v30  ;;  %v1105_v30 = vor.u32 1.1754944e-38, %v1104_v6 }
 0x408   :  { %1431 = vmatpush.msra.mxu2 %v2794_v39 }
 0x409   :  { %v1081_v49 = vsel %vm1080_vm1, %v1881_v13, %v1077_v35  ;;  %v1106_v29 = vsel %vm1103_vm7, %v1105_v30, %v1101_v2  ;;  %v3186_v2 = vld [vmem:[#allocation36_spill] sm:$0xff] }
 0x40a   :  { %v1086_v56 = vsel %vm1083_vm3, %v1085_v7, %v1081_v49  ;;  %v1111_v57 = vsub.f32 1.0, %v1106_v29  ;;  %v1113_v7 = vmul.f32 %v1106_v29, %v2799_v34  ;;  %v3188_v30 = vld [vmem:[#allocation40_spill] sm:$0xff] }
 0x40b   :  { %v1108_v36 = vmul.f32 %v1086_v56, %v1066_v4 }
 0x40d   :  { %v1109_v40 = vadd.f32 %v1108_v36, %v2878_v43 }
 0x40f   :  { %1882 = vtanh.f32 %v1109_v40  ;;  %v3183_v40 = vld [vmem:[#allocation22_spill] sm:$0xff] }
 0x415   :  { %v1883_v37 = vpop.eup %1882 }
 0x416   :  { %v1112_v35 = vmul.f32 %v1883_v37, %v1111_v57  ;;  %v3189_v37 = vld [vmem:[#allocation31_spill] sm:$0xff] }
 0x418   :  { %v2908_v49 = vadd.f32 %v1113_v7, %v1112_v35  ;;  %v3190_v7 = vld [vmem:[#allocation33_spill] sm:$0xff] }
 0x41a   :  { %v1116_v56 = vrot.slane %v2908_v49, 1  ;;  %1118 = vst [vmem:[#allocation10 + $0x4] sm:$0x1] %v2908_v49  ;;  %1218 = vmatmul.f32.vlgmr.msrb.gmra.mxu2 %v2908_v49  ;;  %1238 = vmatmul.f32.vlgmr.msra.gmra.mxu3 %v2908_v49 }
 0x41b   :  { %1258 = vmatmul.f32.vlgmr.msrb.gmra.mxu0 %v2908_v49  ;;  %1630 = vmatpush.msrb.mxu2 %v2806_v23 }
 0x41c   :  { %1119 = vst [vmem:[#allocation10 + $0xc] sm:$0x1] %v1116_v56  ;;  %1564 = vmatpush.msrb.mxu0 %v2652_v18  ;;  %v3176_v18 = vld [vmem:[#allocation23_spill] sm:$0xff]  ;;  %v3191_v56 = vld [vmem:[#allocation20_spill] sm:$0xff] }
 0x41d   :  { %1631 = vmatpush.msrb.mxu2 %v2811_v55 }
 0x41e   :  { %1565 = vmatpush.msrb.mxu0 %v2659_v25  ;;  %v3177_v25 = vld [vmem:[#allocation24_spill] sm:$0xff] }
 0x41f   :  { %1632 = vmatpush.msrb.mxu2 %v2816_v50 }
 0x421   :  { %1633 = vmatpush.msrb.mxu2 %v2819_v44 }
 0x423   :  { %1634 = vmatpush.msrb.mxu2 %v2822_v10 }
 0x425   :  { %1635 = vmatpush.msrb.mxu2 %v2825_v59  ;;  %v1159_v59 = vpop.f32.mrf.mxu2 }
 0x427   :  { %1636 = vmatpush.msrb.mxu2 %v2828_v47  ;;  %v3179_v47 = vld [vmem:[#allocation19_spill] sm:$0xff] }
 0x429   :  { %1637 = vmatpush.msrb.mxu2 %v2831_v33 }
 0x42b   :  { %1638 = vmatpush.msrb.mxu2 %v2834_v52  ;;  %v3180_v52 = vld [vmem:[#allocation37_spill] sm:$0xff] }
 0x42d   :  { %1639 = vmatpush.msrb.mxu2 %v2837_v53  ;;  %v1179_v33 = vpop.f32.mrf.mxu2  ;;  %v3181_v53 = vld [vmem:[#allocation39_spill] sm:$0xff] }
 0x42f   :  { %1640 = vmatpush.msrb.mxu2 %v2840_v3 }
 0x431   :  { %1641 = vmatpush.msrb.mxu2 %v3176_v18 }
 0x433   :  { %1642 = vmatpush.msrb.mxu2 %v3177_v25 }
 0x435   :  { %1643 = vmatpush.msrb.mxu2 %v3178_v32  ;;  %v2956_v3 = vpop.f32.mrf.mxu2 }
 0x437   :  { %1644 = vmatpush.msrb.mxu2 %v2852_v41 }
 0x439   :  { %1645 = vmatpush.msrb.mxu2 %v2855_v11 }
 0x441   :  { %v1320_v6 = vpop.permute.xlu2 %1319 }
 0x442   :  { %v1321_v34 = vperm.slane %v1320_v6, 0 }
 0x444   :  { %vm1323_vm8 = vcmp.eq.s32.totalorder %v1321_v34, %v2337_v54 }
 0x445   :  { %v1786_v23 = vsel %vm1323_vm8, 1.0, %v3127_v21 }
 0x446   :  { %1332 = vst [vmem:[#allocation1 + $0x1] ss:$9 sm:$0xff] %v1786_v23 }
 0x459   :  { %v1316_v55 = vpop.permute.xlu1 %1315 }
 0x45a   :  { %v1317_v50 = vperm.slane %v1316_v55, 0 }
 0x45c   :  { %vm1322_vm9 = vcmp.eq.s32.totalorder %v1317_v50, %v2320_v45 }
 0x45d   :  { %v1785_v44 = vsel %vm1322_vm9, 1.0, %v3127_v21 }
 0x45e   :  { %1330 = vst [vmem:[#allocation1] ss:$9 sm:$0xff] %v1785_v44 }
 0x465   :  { %v1333_v10 = vld [vmem:[#allocation1] sm:$0xff] }
 0x466   :  { %1787 = vmatmul.msk.f32.vlgmr.msrb.gmra.mxu1 %vm162_vm2, %v1333_v10 }
 0x467   :  { %1390 = vmatpush.msrb.mxu1 %v2684_v58 }
 0x469   :  { %1391 = vmatpush.msrb.mxu1 %v2687_v60 }
 0x46e   :  { %1788 = vmatmul.msk.f32.vlgmr.msra.gmra.mxu1 %vm162_vm2, %v1333_v10 }
 0x46f   :  { %1396 = vmatpush.msra.mxu1 %v2691_v61 }
 0x471   :  { %1397 = vmatpush.msra.mxu1 %v2694_v62 }
 0x473   :  { %1398 = vmatpush.msra.mxu1 %v2697_v63 }
 0x475   :  { %1399 = vmatpush.msra.mxu1 %v2700_v19 }
 0x476   :  { %1789 = vmatmul.msk.f32.vlgmr.msrb.gmra.mxu1 %vm162_vm2, %v1333_v10 }
 0x477   :  { %1400 = vmatpush.msra.mxu1 %v2704_v42 }
 0x479   :  { %1401 = vmatpush.msra.mxu1 %v2707_v46 }
 0x47b   :  { %1402 = vmatpush.msra.mxu1 %v2710_v14 }
 0x47d   :  { %1403 = vmatpush.msra.mxu1 %v2713_v16 }
 0x47f   :  { %1404 = vmatpush.msra.mxu1 %v3179_v47 }
 0x481   :  { %1405 = vmatpush.msra.mxu1 %v3180_v52 }
 0x483   :  { %1406 = vmatpush.msra.mxu1 %v2722_v12 }
 0x485   :  { %1407 = vmatpush.msra.mxu1 %v3181_v53 }
 0x487   :  { %1408 = vmatpush.msra.mxu1 %v2730_v8 }
 0x489   :  { %1409 = vmatpush.msra.mxu1 %v2733_v48 }
 0x48b   :  { %1410 = vmatpush.msra.mxu1 %v2736_v0 }
 0x48d   :  { %1411 = vmatpush.msra.mxu1 %v2741_v1 }
 0x48f   :  { %1610 = vmatpush.msrb.mxu1 %v2744_v9  ;;  %v2140_v9 = vmov 7  }
 0x490   :  { %1831 = vset.pattern.permute.xlu1 %v2140_v9  ;;  %1832 = vset.pattern.permute.xlu2 %v2140_v9 }
 0x491   :  { %1611 = vmatpush.msrb.mxu1 %v2747_v15  ;;  %v3184_v15 = vld [vmem:[#allocation41_spill] sm:$0xff]  ;;  %1833 = vset.pattern.permute.xlu0 %v2140_v9 }
 0x492   :  { %1509 = vperm.xlu1 %1831, %v3184_v15  }
 0x493   :  { %1612 = vmatpush.msrb.mxu1 %v2750_v22  ;;  %v3185_v22 = vld [vmem:[#allocation18_spill] sm:$0xff] }
 0x494   :  { %1513 = vperm.xlu2 %1832, %v3185_v22  }
 0x495   :  { %1613 = vmatpush.msrb.mxu1 %v2753_v24  ;;  %v3187_v24 = vld [vmem:[#allocation38_spill] sm:$0xff] }
 0x497   :  { %1614 = vmatpush.msrb.mxu1 %v2756_v26 }
 0x498   :  { %v1259_v10 = vpop.f32.mrf.mxu0 }
 0x499   :  { %1615 = vmatpush.msrb.mxu1 %v3183_v40 }
 0x49b   :  { %1616 = vmatpush.msrb.mxu1 %v3186_v2 }
 0x49d   :  { %v1219_v41 = vpop.f32.mrf.mxu2  ;;  %v1239_v11 = vpop.f32.mrf.mxu3  ;;  %1617 = vmatpush.msrb.mxu1 %v3187_v24 }
 0x49e   :  { %v1220_v43 = vadd.f32 %v1219_v41, %v2451_v31  ;;  %v1240_v51 = vadd.f32 %v1239_v11, %v3182_v20 }
 0x49f   :  { %1618 = vmatpush.msrb.mxu1 %v3188_v30 }
 0x4a0   :  { %v1262_v13 = vadd.f32 %v1220_v43, %v1159_v59  ;;  %v1282_v4 = vadd.f32 %v1240_v51, %v1179_v33 }
 0x4a1   :  { %1619 = vmatpush.msrb.mxu1 %v3189_v37 }
 0x4a2   :  { %v1783_v5 = vmul.f32 -1.442695, %v1262_v13  ;;  %v1784_v36 = vmul.f32 -1.442695, %v1282_v4 }
 0x4a3   :  { %1620 = vmatpush.msrb.mxu1 %v3190_v7 }
 0x4a4   :  { %1884 = vpow2.f32 %v1783_v5 }
 0x4a5   :  { %1886 = vpow2.f32 %v1784_v36  ;;  %1621 = vmatpush.msrb.mxu1 %v3191_v56 }
 0x4a7   :  { %1622 = vmatpush.msrb.mxu1 %v2784_v27 }
 0x4a9   :  { %1623 = vmatpush.msrb.mxu1 %v2787_v17  ;;  %v1260_v17 = vadd.f32 %v1259_v10, %v2469_v28 }
 0x4aa   :  { %v1885_v26 = vpop.eup %1884 }
 0x4ab   :  { %v1887_v29 = vpop.eup %1886  ;;  %v1266_v57 = vadd.f32 1.0, %v1885_v26  ;;  %1624 = vmatpush.msrb.mxu1 %v3175_v38 }
 0x4ac   :  { %v1286_v35 = vadd.f32 1.0, %v1887_v29 }
 0x4ad   :  { %1888 = vrcp.f32 %v1266_v57  ;;  %v1278_v23 = vand.u32 2147483648, %v1266_v57  ;;  %1625 = vmatpush.msrb.mxu1 %v2794_v39  ;;  %v1276_v44 = vand.u32 2147483647, %v1266_v57  ;;  %vm1272_vm11 = vweird.f32 %v1266_v57 }
 0x4ae   :  { %1890 = vrcp.f32 %v1286_v35  ;;  %v1298_v51 = vand.u32 2147483648, %v1286_v35  ;;  %vm1292_vm15 = vweird.f32 %v1286_v35  ;;  %v1296_v39 = vand.u32 2147483647, %v1286_v35 }
 0x4af   :  { %v1279_v27 = vor.u32 1.1754944e-38, %v1278_v23  ;;  %vm1277_vm13 = vcmp.eq.f32.partialorder %v1276_v44, 8.507059e+37 }
 0x4b0   :  { %v1299_v5 = vor.u32 1.1754944e-38, %v1298_v51  ;;  %vm1297_vm1 = vcmp.eq.f32.partialorder %v1296_v39, 8.507059e+37 }
 0x4b3   :  { %v1889_v18 = vpop.eup %1888 }
 0x4b4   :  { %v1891_v25 = vpop.eup %1890  ;;  %v1268_v32 = vmul.f32 %v1889_v18, %v1266_v57  ;;  %vm1273_vm10 = vweird.f32 %v1889_v18 }
 0x4b5   :  { %v1288_v6 = vmul.f32 %v1891_v25, %v1286_v35  ;;  %vm1274_vm12 = vmor %vm1272_vm11, %vm1273_vm10  ;;  %vm1293_vm14 = vweird.f32 %v1891_v25 }
 0x4b6   :  { %v1269_v34 = vsub.f32 1.0, %v1268_v32  ;;  %vm1294_vm0 = vmor %vm1292_vm15, %vm1293_vm14 }
 0x4b7   :  { %v1289_v55 = vsub.f32 1.0, %v1288_v6 }
 0x4b8   :  { %v1270_v50 = vmul.f32 %v1889_v18, %v1269_v34 }
 0x4b9   :  { %v1290_v59 = vmul.f32 %v1891_v25, %v1289_v55 }
 0x4ba   :  { %v1271_v33 = vadd.f32 %v1889_v18, %v1270_v50 }
 0x4bb   :  { %v1291_v38 = vadd.f32 %v1891_v25, %v1290_v59 }
 0x4bc   :  { %v1275_v41 = vsel %vm1274_vm12, %v1889_v18, %v1271_v33 }
 0x4bd   :  { %v1280_v11 = vsel %vm1277_vm13, %v1279_v27, %v1275_v41  ;;  %v1295_v4 = vsel %vm1294_vm0, %v1891_v25, %v1291_v38 }
 0x4be   :  { %v1302_v43 = vmul.f32 %v1280_v11, %v1260_v17  ;;  %v1300_v36 = vsel %vm1297_vm1, %v1299_v5, %v1295_v4 }
 0x4bf   :  { %v1305_v40 = vsub.f32 1.0, %v1300_v36  ;;  %v1307_v22 = vmul.f32 %v1300_v36, %v2908_v49 }
 0x4c0   :  { %v1303_v13 = vadd.f32 %v1302_v43, %v2956_v3 }
 0x4c2   :  { %1892 = vtanh.f32 %v1303_v13 }
 0x4c8   :  { %v1893_v9 = vpop.eup %1892 }
 0x4c9   :  { %v1306_v15 = vmul.f32 %v1893_v9, %v1305_v40 }
 0x4cb   :  { %v2983_v2 = vadd.f32 %v1307_v22, %v1306_v15 }
 0x4cd   :  { %v1310_v24 = vrot.slane %v2983_v2, 1  ;;  %1312 = vst [vmem:[#allocation10 + $0x5] sm:$0x1] %v2983_v2  ;;  %1412 = vmatmul.f32.vlgmr.msra.gmra.mxu1 %v2983_v2  ;;  %1432 = vmatmul.f32.vlgmr.msra.gmra.mxu2 %v2983_v2 }
 0x4ce   :  { %1452 = vmatmul.f32.vlgmr.msrb.gmra.mxu3 %v2983_v2 }
 0x4cf   :  { %1313 = vst [vmem:[#allocation10 + $0xd] sm:$0x1] %v1310_v24 }
 0x4ee   :  { %v1514_v3 = vpop.permute.xlu2 %1513 }
 0x4ef   :  { %v1515_v30 = vperm.slane %v1514_v3, 0 }
 0x4f1   :  { %vm1517_vm3 = vcmp.eq.s32.totalorder %v1515_v30, %v2337_v54  ;;  %v1353_v54 = vpop.f32.mrf.mxu1 }
 0x4f2   :  { %v1793_v26 = vsel %vm1517_vm3, 1.0, %v3127_v21 }
 0x4f3   :  { %1526 = vst [vmem:[#allocation1 + $0x1] ss:$9 sm:$0xff] %v1793_v26 }
 0x504   :  { %v1510_v49 = vpop.permute.xlu1 %1509 }
 0x505   :  { %v1511_v29 = vperm.slane %v1510_v49, 0 }
 0x507   :  { %vm1516_vm4 = vcmp.eq.s32.totalorder %v1511_v29, %v2320_v45  ;;  %v1373_v45 = vpop.f32.mrf.mxu1 }
 0x508   :  { %v1792_v57 = vsel %vm1516_vm4, 1.0, %v3127_v21 }
 0x509   :  { %1524 = vst [vmem:[#allocation1] ss:$9 sm:$0xff] %v1792_v57 }
 0x50f   :  { %v1393_v21 = vpop.f32.mrf.mxu1 }
 0x510   :  { %v1527_v37 = vld [vmem:[#allocation1] sm:$0xff] }
 0x511   :  { %1794 = vmatmul.msk.f32.vlgmr.msra.gmra.mxu0 %vm162_vm2, %v1527_v37 }
 0x512   :  { %1584 = vmatpush.msra.mxu0 %v2684_v58 }
 0x514   :  { %1585 = vmatpush.msra.mxu0 %v2687_v60 }
 0x519   :  { %1795 = vmatmul.msk.f32.vlgmr.msrb.gmra.mxu0 %vm162_vm2, %v1527_v37 }
 0x51a   :  { %1590 = vmatpush.msrb.mxu0 %v2691_v61 }
 0x51c   :  { %1591 = vmatpush.msrb.mxu0 %v2694_v62 }
 0x51e   :  { %1592 = vmatpush.msrb.mxu0 %v2697_v63 }
 0x520   :  { %1593 = vmatpush.msrb.mxu0 %v2700_v19 }
 0x521   :  { %1796 = vmatmul.msk.f32.vlgmr.msra.gmra.mxu0 %vm162_vm2, %v1527_v37 }
 0x522   :  { %1594 = vmatpush.msrb.mxu0 %v2704_v42 }
 0x524   :  { %1595 = vmatpush.msrb.mxu0 %v2707_v46 }
 0x526   :  { %1596 = vmatpush.msrb.mxu0 %v2710_v14 }
 0x528   :  { %1597 = vmatpush.msrb.mxu0 %v2713_v16 }
 0x52a   :  { %1598 = vmatpush.msrb.mxu0 %v3179_v47 }
 0x52c   :  { %1599 = vmatpush.msrb.mxu0 %v3180_v52 }
 0x52e   :  { %1600 = vmatpush.msrb.mxu0 %v2722_v12 }
 0x530   :  { %1601 = vmatpush.msrb.mxu0 %v3181_v53 }
 0x532   :  { %1602 = vmatpush.msrb.mxu0 %v2730_v8 }
 0x534   :  { %1603 = vmatpush.msrb.mxu0 %v2733_v48 }
 0x536   :  { %1604 = vmatpush.msrb.mxu0 %v2736_v0 }
 0x538   :  { %1605 = vmatpush.msrb.mxu0 %v2741_v1 }
 0x54a   :  { %v1413_v58 = vpop.f32.mrf.mxu1 }
 0x54b   :  { %v1414_v60 = vadd.f32 %v1413_v58, %v2451_v31 }
 0x54d   :  { %v1456_v61 = vadd.f32 %v1414_v60, %v1353_v54 }
 0x54f   :  { %v1790_v62 = vmul.f32 -1.442695, %v1456_v61 }
 0x550   :  { %v1433_v63 = vpop.f32.mrf.mxu2 }
 0x551   :  { %1894 = vpow2.f32 %v1790_v62  ;;  %v1434_v19 = vadd.f32 %v1433_v63, %v3182_v20  ;;  %v1453_v7 = vpop.f32.mrf.mxu3 }
 0x552   :  { %v1454_v6 = vadd.f32 %v1453_v7, %v2469_v28 }
 0x553   :  { %v1476_v42 = vadd.f32 %v1434_v19, %v1373_v45 }
 0x555   :  { %v1791_v46 = vmul.f32 -1.442695, %v1476_v42 }
 0x557   :  { %v1895_v14 = vpop.eup %1894  ;;  %1896 = vpow2.f32 %v1791_v46 }
 0x558   :  { %v1460_v16 = vadd.f32 1.0, %v1895_v14 }
 0x55a   :  { %1898 = vrcp.f32 %v1460_v16  ;;  %v1472_v47 = vand.u32 2147483648, %v1460_v16  ;;  %v1470_v53 = vand.u32 2147483647, %v1460_v16  ;;  %vm1466_vm5 = vweird.f32 %v1460_v16 }
 0x55c   :  { %v1473_v25 = vor.u32 1.1754944e-38, %v1472_v47  ;;  %vm1471_vm7 = vcmp.eq.f32.partialorder %v1470_v53, 8.507059e+37 }
 0x55d   :  { %v1897_v12 = vpop.eup %1896 }
 0x55e   :  { %v1480_v8 = vadd.f32 1.0, %v1897_v12 }
 0x560   :  { %v1899_v48 = vpop.eup %1898  ;;  %1900 = vrcp.f32 %v1480_v8  ;;  %v1492_v50 = vand.u32 2147483648, %v1480_v8  ;;  %v1490_v10 = vand.u32 2147483647, %v1480_v8  ;;  %vm1486_vm9 = vweird.f32 %v1480_v8 }
 0x561   :  { %v1462_v0 = vmul.f32 %v1899_v48, %v1460_v16  ;;  %vm1467_vm2 = vweird.f32 %v1899_v48 }
 0x562   :  { %vm1468_vm6 = vmor %vm1466_vm5, %vm1467_vm2  ;;  %v1493_v27 = vor.u32 1.1754944e-38, %v1492_v50  ;;  %vm1491_vm11 = vcmp.eq.f32.partialorder %v1490_v10, 8.507059e+37 }
 0x563   :  { %v1463_v1 = vsub.f32 1.0, %v1462_v0 }
 0x565   :  { %v1464_v52 = vmul.f32 %v1899_v48, %v1463_v1 }
 0x566   :  { %v1901_v35 = vpop.eup %1900 }
 0x567   :  { %v1482_v56 = vmul.f32 %v1901_v35, %v1480_v8  ;;  %v1465_v18 = vadd.f32 %v1899_v48, %v1464_v52  ;;  %vm1487_vm8 = vweird.f32 %v1901_v35 }
 0x568   :  { %vm1488_vm10 = vmor %vm1486_vm9, %vm1487_vm8 }
 0x569   :  { %v1483_v32 = vsub.f32 1.0, %v1482_v56  ;;  %v1469_v34 = vsel %vm1468_vm6, %v1899_v48, %v1465_v18 }
 0x56a   :  { %v1474_v23 = vsel %vm1471_vm7, %v1473_v25, %v1469_v34 }
 0x56b   :  { %v1484_v55 = vmul.f32 %v1901_v35, %v1483_v32  ;;  %v1496_v44 = vmul.f32 %v1474_v23, %v1454_v6 }
 0x56d   :  { %v1485_v59 = vadd.f32 %v1901_v35, %v1484_v55  ;;  %v1497_v33 = vadd.f32 %v1496_v44, %v1393_v21 }
 0x56f   :  { %v1489_v17 = vsel %vm1488_vm10, %v1901_v35, %v1485_v59  ;;  %1902 = vtanh.f32 %v1497_v33 }
 0x570   :  { %v1494_v41 = vsel %vm1491_vm11, %v1493_v27, %v1489_v17 }
 0x571   :  { %v1499_v11 = vsub.f32 1.0, %v1494_v41  ;;  %v1501_v51 = vmul.f32 %v1494_v41, %v2983_v2 }
 0x575   :  { %v1903_v38 = vpop.eup %1902 }
 0x576   :  { %v1500_v43 = vmul.f32 %v1903_v38, %v1499_v11 }
 0x578   :  { %v1502_v39 = vadd.f32 %v1501_v51, %v1500_v43 }
 0x57a   :  { %v1504_v13 = vrot.slane %v1502_v39, 1  ;;  %1506 = vst [vmem:[#allocation10 + $0x6] sm:$0x1] %v1502_v39  ;;  %1606 = vmatmul.f32.vlgmr.msrb.gmra.mxu0 %v1502_v39  ;;  %1626 = vmatmul.f32.vlgmr.msrb.gmra.mxu1 %v1502_v39 }
 0x57b   :  { %1646 = vmatmul.f32.vlgmr.msrb.gmra.mxu2 %v1502_v39 }
 0x57c   :  { %1507 = vst [vmem:[#allocation10 + $0xe] sm:$0x1] %v1504_v13 }
 0x58e   :  { %v1547_v4 = vpop.f32.mrf.mxu0 }
 0x596   :  { %v1567_v5 = vpop.f32.mrf.mxu0 }
 0x59e   :  { %v1587_v36 = vpop.f32.mrf.mxu0 }
 0x5f7   :  { %v1607_v40 = vpop.f32.mrf.mxu0  ;;  %v1627_v9 = vpop.f32.mrf.mxu1 }
 0x5f8   :  { %v1608_v15 = vadd.f32 %v1607_v40, %v2451_v31  ;;  %v1628_v22 = vadd.f32 %v1627_v9, %v3182_v20 }
 0x5fa   :  { %v1650_v24 = vadd.f32 %v1608_v15, %v1547_v4  ;;  %v1670_v3 = vadd.f32 %v1628_v22, %v1567_v5 }
 0x5fc   :  { %v1797_v30 = vmul.f32 -1.442695, %v1650_v24  ;;  %v1798_v2 = vmul.f32 -1.442695, %v1670_v3 }
 0x5fe   :  { %1904 = vpow2.f32 %v1797_v30  ;;  %v1647_v63 = vpop.f32.mrf.mxu2 }
 0x5ff   :  { %1906 = vpow2.f32 %v1798_v2  ;;  %v1648_v46 = vadd.f32 %v1647_v63, %v2469_v28 }
 0x604   :  { %v1905_v26 = vpop.eup %1904 }
 0x605   :  { %v1907_v49 = vpop.eup %1906  ;;  %v1654_v29 = vadd.f32 1.0, %v1905_v26 }
 0x606   :  { %v1674_v57 = vadd.f32 1.0, %v1907_v49 }
 0x607   :  { %1908 = vrcp.f32 %v1654_v29  ;;  %v1666_v60 = vand.u32 2147483648, %v1654_v29  ;;  %v1664_v61 = vand.u32 2147483647, %v1654_v29  ;;  %vm1660_vm13 = vweird.f32 %v1654_v29 }
 0x608   :  { %1910 = vrcp.f32 %v1674_v57  ;;  %v1686_v8 = vand.u32 2147483648, %v1674_v57  ;;  %vm1680_vm1 = vweird.f32 %v1674_v57  ;;  %v1684_v0 = vand.u32 2147483647, %v1674_v57 }
 0x609   :  { %v1667_v42 = vor.u32 1.1754944e-38, %v1666_v60  ;;  %vm1665_vm15 = vcmp.eq.f32.partialorder %v1664_v61, 8.507059e+37 }
 0x60a   :  { %v1687_v52 = vor.u32 1.1754944e-38, %v1686_v8  ;;  %vm1685_vm4 = vcmp.eq.f32.partialorder %v1684_v0, 8.507059e+37 }
 0x60d   :  { %v1909_v37 = vpop.eup %1908 }
 0x60e   :  { %v1911_v54 = vpop.eup %1910  ;;  %v1656_v45 = vmul.f32 %v1909_v37, %v1654_v29  ;;  %vm1661_vm12 = vweird.f32 %v1909_v37 }
 0x60f   :  { %v1676_v21 = vmul.f32 %v1911_v54, %v1674_v57  ;;  %vm1662_vm14 = vmor %vm1660_vm13, %vm1661_vm12  ;;  %vm1681_vm0 = vweird.f32 %v1911_v54 }
 0x610   :  { %v1657_v58 = vsub.f32 1.0, %v1656_v45  ;;  %vm1682_vm3 = vmor %vm1680_vm1, %vm1681_vm0 }
 0x611   :  { %v1677_v31 = vsub.f32 1.0, %v1676_v21 }
 0x612   :  { %v1658_v20 = vmul.f32 %v1909_v37, %v1657_v58 }
 0x613   :  { %v1678_v62 = vmul.f32 %v1911_v54, %v1677_v31 }
 0x614   :  { %v1659_v19 = vadd.f32 %v1909_v37, %v1658_v20 }
 0x615   :  { %v1679_v12 = vadd.f32 %v1911_v54, %v1678_v62 }
 0x616   :  { %v1663_v14 = vsel %vm1662_vm14, %v1909_v37, %v1659_v19 }
 0x617   :  { %v1668_v16 = vsel %vm1665_vm15, %v1667_v42, %v1663_v14  ;;  %v1683_v47 = vsel %vm1682_vm3, %v1911_v54, %v1679_v12 }
 0x618   :  { %v1690_v48 = vmul.f32 %v1668_v16, %v1648_v46  ;;  %v1688_v53 = vsel %vm1685_vm4, %v1687_v52, %v1683_v47 }
 0x619   :  { %v1693_v35 = vsub.f32 1.0, %v1688_v53  ;;  %v1695_v28 = vmul.f32 %v1688_v53, %v1502_v39 }
 0x61a   :  { %v1691_v1 = vadd.f32 %v1690_v48, %v1587_v36 }
 0x61c   :  { %1912 = vtanh.f32 %v1691_v1 }
 0x622   :  { %v1913_v7 = vpop.eup %1912 }
 0x623   :  { %v1694_v56 = vmul.f32 %v1913_v7, %v1693_v35 }
 0x625   :  { %v1696_v18 = vadd.f32 %v1695_v28, %v1694_v56 }
 0x627   :  { %v1698_v25 = vrot.slane %v1696_v18, 1  ;;  %1700 = vst [vmem:[#allocation10 + $0x7] sm:$0x1] %v1696_v18 }
 0x628   :  { %1702 = vst [vmem:[#allocation11] sm:$0x1] %v1696_v18 }
 0x629   :  { %1701 = vst [vmem:[#allocation10 + $0xf] sm:$0x1] %v1698_v25 }
 0x62a   :  { %1703 = vst [vmem:[#allocation11 + $0x1] sm:$0x1] %v1698_v25  ;;  %1716 = dma.vmem_to_hbm [thread:$0]  %s1709_s3, 256, %s1711_s17, [#allocation4], %s2143_s23, %s2143_s23, %s2144_s24  }
 0x62b   :  { %1729 = dma.vmem_to_hbm [thread:$0]  %s1722_s19, 32, %s1724_s22, [#allocation12], %s2128_s30, %s2128_s30, %s2129_s6  }
 0x62c   :  { %2120 = dma.done.wait [#allocation4], 256  }
 0x62d   :  { %2121 = vsyncadd [#allocation4], 4294967040 }
 0x62e   :  { %2122 = dma.done.wait [#allocation12], 32  }
 0x62f   :  { %2123 = vsyncadd [#allocation12], 4294967264 }
 0x630   :  { %1738 = vsyncpa [#allocation3], 1 }
 0x631   :  { %1739 = vsyncpa [#allocation6], 1 }
 0x632   :  { %1740 = vsyncpa [#allocation9], 1 }
 0x633   :  { %1741 = vsyncpa [#allocation4], 1 }
 0x634   :  { %1742 = vsyncpa [#allocation12], 1 }

</bundles_post_ra>
